<compile_context>
chip_gen: v5e
topology: v5e:2x2
jax: 0.10.0
libtpu: 0.0.40
codegen_flags: <defaults>
</compile_context>

<pallas_src>
import jax
import jax.numpy as jnp
from jax import lax
from jax.experimental import pallas as pl
from jax.experimental.pallas import tpu as pltpu

EPS = 1e-5
NEG_SLOPE = 0.1

# ConvTranspose2d(k=4, s=2, p=1):  oh = 2*ih - 1 + kh
#   even output rows use kernel taps kh in {3, 1}, odd rows use {2, 0}
# _TAP[parity][d] -> kernel tap index for the d-th of the two contributing rows.
_TAP = ((3, 1), (2, 0))


# ------------------------------ Pallas kernel ------------------------------ #
def _tconv_bn_lrelu_kernel(x_ref, w_ref, o_ref):
    """Fused ConvTranspose2d(4,2,1) + BatchNorm2d(train) + LeakyReLU(0.1).

    x_ref: [9, IC, M]      bf16 -- 9 shifted channel-major views of padded input
    w_ref: [16, OC_t, IC]  bf16 -- per-(phase, 2x2-tap) weight slices
    o_ref: [4, OC_t, M]    f32  -- per-output-parity result, lane-dense in M
    """
    m = o_ref.shape[-1]
    inv_n = 1.0 / (4 * m)          # BN reduces over 4 phases * M = N*(2H)*(2W)

    # 16 shifted bf16 GEMMs (4 phases x 4 taps), f32 accumulation on the MXU.
    ys = []
    for p in range(4):
        pr, pc = p // 2, p % 2
        acc = None
        for d in range(4):
            dr, dc = d // 2, d % 2
            s = (pr + dr) * 3 + (pc + dc)          # absolute shift index
            y = jnp.dot(w_ref[p * 4 + d], x_ref[s],
                        preferred_element_type=jnp.float32)    # [OC_t, M]
            acc = y if acc is None else acc + y
        ys.append(acc)

    # BatchNorm2d training-mode stats (biased variance) over (N, H_out, W_out)
    # == over all 4 phases and all M columns, independently per channel row.
    s1 = ys[0].sum(axis=1, keepdims=True)
    for y in ys[1:]:
        s1 = s1 + y.sum(axis=1, keepdims=True)
    mean = s1 * inv_n
    s2 = ((ys[0] - mean) ** 2).sum(axis=1, keepdims=True)
    for y in ys[1:]:
        s2 = s2 + ((y - mean) ** 2).sum(axis=1, keepdims=True)
    var = s2 * inv_n

    scale = lax.rsqrt(var + EPS)       # EUP slot -> effectively free
    shift = -mean * scale              # BN folded to one multiply-add / element
    for p in range(4):
        yn = ys[p] * scale + shift
        o_ref[p] = jnp.where(yn >= 0.0, yn, NEG_SLOPE * yn)


# -------------------------------- JAX glue --------------------------------- #
def _pick_oc_tile(oc):
    # Largest sublane-aligned (multiple-of-8) tile that still gives >= 2 grid
    # steps, for double-buffering and v7x dual-TensorCore sharding.
    for t in (128, 64, 32, 16, 8):
        if oc % t == 0 and oc // t >= 2:
            return t
    return oc


def _shifted_views(x):
    """x: [N, IC, H, W] f32 -> [9, IC, N*H*W] bf16 (shift index = r0*3 + c0)."""
    n, ic, h, w = x.shape
    xt = jnp.transpose(x, (1, 0, 2, 3))                  # channel-major
    xp = jnp.pad(xt, ((0, 0), (0, 0), (1, 1), (1, 1)))   # effective pad = 1
    views = []
    for r0 in range(3):
        for c0 in range(3):
            views.append(xp[:, :, r0:r0 + h, c0:c0 + w].reshape(ic, n * h * w))
    # TODO(synk): for production shapes, build these 9 views inside the kernel
    # via manual DMA of the padded NCHW input to avoid the 9x HBM blow-up.
    return jnp.stack(views, axis=0).astype(jnp.bfloat16)


def _phase_taps(wt):
    """wt: [IC, OC, 4, 4] (ConvTranspose2d layout) -> [16, OC, IC] bf16."""
    taps = []
    for pr in range(2):
        for pc in range(2):
            for dr in range(2):
                for dc in range(2):
                    taps.append(wt[:, :, _TAP[pr][dr], _TAP[pc][dc]].T)  # [OC, IC]
    return jnp.stack(taps, axis=0).astype(jnp.bfloat16)


def upsample_conv(x, wt, b=None):
    """UpSampleConv.forward: ConvTranspose2d(4,2,1) + BatchNorm2d + LeakyReLU(0.1).

    x: [N, IC, H, W] f32, wt: [IC, OC, 4, 4] f32, b: [OC] (accepted for interface
    fidelity but unused -- BatchNorm with beta=0 subtracts the per-channel mean,
    cancelling the conv bias exactly).  Returns [N, OC, 2H, 2W] f32.
    """
    del b
    n, ic, h, w = x.shape
    oc = wt.shape[1]
    m = n * h * w

    shifted = _shifted_views(x)       # [9, IC, M]   bf16
    taps = _phase_taps(wt)            # [16, OC, IC] bf16
    oc_t = _pick_oc_tile(oc)

    out = pl.pallas_call(
        _tconv_bn_lrelu_kernel,
        out_shape=jax.ShapeDtypeStruct((4, oc, m), jnp.float32),
        grid_spec=pltpu.PrefetchScalarGridSpec(
            num_scalar_prefetch=0,
            grid=(oc // oc_t,),
            in_specs=[
                # shifted activations stay VMEM-resident across all OC tiles
                pl.BlockSpec((9, ic, m), lambda j: (0, 0, 0)),
                pl.BlockSpec((16, oc_t, ic), lambda j: (0, j, 0)),
            ],
            out_specs=pl.BlockSpec((4, oc_t, m), lambda j: (0, j, 0)),
        ),
        compiler_params=pltpu.CompilerParams(
            dimension_semantics=("parallel",),     # shard OC tiles across TCs (v7x)
            vmem_limit_bytes=48 * 1024 * 1024,     # stay inside v7x's 64 MiB VMEM
        ),
    )(shifted, taps)

    # [pr*2+pc, OC, (n, h, w)] f32 -> NCHW with interleaved output parities.
    out = out.reshape(2, 2, oc, n, h, w).transpose(3, 2, 4, 0, 5, 1)
    return out.reshape(n, oc, 2 * h, 2 * w)


# ---------------------------------- main ----------------------------------- #
if __name__ == "__main__":
    N, IC, OC, H, W = 2, 4, 32, 16, 16

    key = jax.random.PRNGKey(0)
    kx, kw, kb = jax.random.split(key, 3)
    x = jax.random.normal(kx, (N, IC, H, W), jnp.float32)
    wt = jax.random.uniform(kw, (IC, OC, 4, 4), jnp.float32, minval=-0.1, maxval=0.1)
    b = jax.random.uniform(kb, (OC,), jnp.float32, minval=-0.1, maxval=0.1)

    out = jax.jit(upsample_conv)(x, wt, b)
    jax.block_until_ready(out)
    assert out.shape == (N, OC, 2 * H, 2 * W), out.shape

    # f32 reference of the PyTorch module: ConvTranspose2d (+bias) ->
    # training-mode BatchNorm2d (gamma=1, beta=0) -> LeakyReLU(0.1).
    w_conv = jnp.flip(wt, axis=(2, 3)).transpose(1, 0, 2, 3)        # [OC, IC, 4, 4]
    ref = lax.conv_general_dilated(
        x, w_conv, window_strides=(1, 1), padding=[(2, 2), (2, 2)],
        lhs_dilation=(2, 2), dimension_numbers=("NCHW", "OIHW", "NCHW"),
        precision=lax.Precision.HIGHEST)
    ref = ref + b[None, :, None, None]
    mu = jnp.mean(ref, axis=(0, 2, 3), keepdims=True)
    var = jnp.mean((ref - mu) ** 2, axis=(0, 2, 3), keepdims=True)
    ref = (ref - mu) * lax.rsqrt(var + EPS)
    ref = jnp.where(ref >= 0, ref, NEG_SLOPE * ref)

    err = float(jnp.max(jnp.abs(out - ref)))
    assert err < 0.1, f"max abs error vs f32 reference: {err}"
    print("KERNEL_OK")
</pallas_src>

<mosaic_0001>
module attributes {stable_mosaic.version = 11 : i64} {
  func.func @_tconv_bn_lrelu_kernel(%arg0: i32, %arg1: memref<9x4x512xbf16, #tpu.memory_space<vmem>>, %arg2: memref<16x16x4xbf16, #tpu.memory_space<vmem>>, %arg3: memref<4x16x512xf32, #tpu.memory_space<vmem>>) attributes {dimension_semantics = [#tpu.dimension_semantics<parallel>], iteration_bounds = array<i64: 2>, scalar_prefetch = 0 : i64, scratch_operands = 0 : i64, tpu.core_type = #tpu.core_type<tc>, window_params = [{pipeline_mode = #tpu.pipeline_mode<synchronous>, transform_indices = @transform_0, window_bounds = array<i64: 9, 4, 512>}, {transform_indices = @transform_1, window_bounds = array<i64: 16, 16, 4>}, {transform_indices = @transform_2, window_bounds = array<i64: 4, 16, 512>}]} {
    %c0 = arith.constant 0 : index
    %c0_0 = arith.constant 0 : index
    %c0_1 = arith.constant 0 : index
    %0 = vector.load %arg2[%c0, %c0_0, %c0_1] : memref<16x16x4xbf16, #tpu.memory_space<vmem>>, vector<1x16x4xbf16>
    %1 = vector.shape_cast %0 : vector<1x16x4xbf16> to vector<16x4xbf16>
    %c0_2 = arith.constant 0 : index
    %c0_3 = arith.constant 0 : index
    %c0_4 = arith.constant 0 : index
    %2 = vector.load %arg1[%c0_2, %c0_3, %c0_4] : memref<9x4x512xbf16, #tpu.memory_space<vmem>>, vector<1x4x512xbf16>
    %3 = vector.shape_cast %2 : vector<1x4x512xbf16> to vector<4x512xbf16>
    %cst = arith.constant dense<0.000000e+00> : vector<16x512xf32>
    %4 = tpu.matmul %1, %3, %cst {dimension_numbers = #tpu.dot_dimension_numbers<[1], [0], [0], [1], [0, 0, 1, 1], [], []>} : vector<16x4xbf16>, vector<4x512xbf16>, vector<16x512xf32> -> vector<16x512xf32>
    %c1 = arith.constant 1 : index
    %c0_5 = arith.constant 0 : index
    %c0_6 = arith.constant 0 : index
    %5 = vector.load %arg2[%c1, %c0_5, %c0_6] : memref<16x16x4xbf16, #tpu.memory_space<vmem>>, vector<1x16x4xbf16>
    %6 = vector.shape_cast %5 : vector<1x16x4xbf16> to vector<16x4xbf16>
    %c1_7 = arith.constant 1 : index
    %c0_8 = arith.constant 0 : index
    %c0_9 = arith.constant 0 : index
    %7 = vector.load %arg1[%c1_7, %c0_8, %c0_9] : memref<9x4x512xbf16, #tpu.memory_space<vmem>>, vector<1x4x512xbf16>
    %8 = vector.shape_cast %7 : vector<1x4x512xbf16> to vector<4x512xbf16>
    %cst_10 = arith.constant dense<0.000000e+00> : vector<16x512xf32>
    %9 = tpu.matmul %6, %8, %cst_10 {dimension_numbers = #tpu.dot_dimension_numbers<[1], [0], [0], [1], [0, 0, 1, 1], [], []>} : vector<16x4xbf16>, vector<4x512xbf16>, vector<16x512xf32> -> vector<16x512xf32>
    %10 = arith.addf %4, %9 : vector<16x512xf32>
    %c2 = arith.constant 2 : index
    %c0_11 = arith.constant 0 : index
    %c0_12 = arith.constant 0 : index
    %11 = vector.load %arg2[%c2, %c0_11, %c0_12] : memref<16x16x4xbf16, #tpu.memory_space<vmem>>, vector<1x16x4xbf16>
    %12 = vector.shape_cast %11 : vector<1x16x4xbf16> to vector<16x4xbf16>
    %c3 = arith.constant 3 : index
    %c0_13 = arith.constant 0 : index
    %c0_14 = arith.constant 0 : index
    %13 = vector.load %arg1[%c3, %c0_13, %c0_14] : memref<9x4x512xbf16, #tpu.memory_space<vmem>>, vector<1x4x512xbf16>
    %14 = vector.shape_cast %13 : vector<1x4x512xbf16> to vector<4x512xbf16>
    %cst_15 = arith.constant dense<0.000000e+00> : vector<16x512xf32>
    %15 = tpu.matmul %12, %14, %cst_15 {dimension_numbers = #tpu.dot_dimension_numbers<[1], [0], [0], [1], [0, 0, 1, 1], [], []>} : vector<16x4xbf16>, vector<4x512xbf16>, vector<16x512xf32> -> vector<16x512xf32>
    %16 = arith.addf %10, %15 : vector<16x512xf32>
    %c3_16 = arith.constant 3 : index
    %c0_17 = arith.constant 0 : index
    %c0_18 = arith.constant 0 : index
    %17 = vector.load %arg2[%c3_16, %c0_17, %c0_18] : memref<16x16x4xbf16, #tpu.memory_space<vmem>>, vector<1x16x4xbf16>
    %18 = vector.shape_cast %17 : vector<1x16x4xbf16> to vector<16x4xbf16>
    %c4 = arith.constant 4 : index
    %c0_19 = arith.constant 0 : index
    %c0_20 = arith.constant 0 : index
    %19 = vector.load %arg1[%c4, %c0_19, %c0_20] : memref<9x4x512xbf16, #tpu.memory_space<vmem>>, vector<1x4x512xbf16>
    %20 = vector.shape_cast %19 : vector<1x4x512xbf16> to vector<4x512xbf16>
    %cst_21 = arith.constant dense<0.000000e+00> : vector<16x512xf32>
    %21 = tpu.matmul %18, %20, %cst_21 {dimension_numbers = #tpu.dot_dimension_numbers<[1], [0], [0], [1], [0, 0, 1, 1], [], []>} : vector<16x4xbf16>, vector<4x512xbf16>, vector<16x512xf32> -> vector<16x512xf32>
    %22 = arith.addf %16, %21 : vector<16x512xf32>
    %c4_22 = arith.constant 4 : index
    %c0_23 = arith.constant 0 : index
    %c0_24 = arith.constant 0 : index
    %23 = vector.load %arg2[%c4_22, %c0_23, %c0_24] : memref<16x16x4xbf16, #tpu.memory_space<vmem>>, vector<1x16x4xbf16>
    %24 = vector.shape_cast %23 : vector<1x16x4xbf16> to vector<16x4xbf16>
    %c1_25 = arith.constant 1 : index
    %c0_26 = arith.constant 0 : index
    %c0_27 = arith.constant 0 : index
    %25 = vector.load %arg1[%c1_25, %c0_26, %c0_27] : memref<9x4x512xbf16, #tpu.memory_space<vmem>>, vector<1x4x512xbf16>
    %26 = vector.shape_cast %25 : vector<1x4x512xbf16> to vector<4x512xbf16>
    %cst_28 = arith.constant dense<0.000000e+00> : vector<16x512xf32>
    %27 = tpu.matmul %24, %26, %cst_28 {dimension_numbers = #tpu.dot_dimension_numbers<[1], [0], [0], [1], [0, 0, 1, 1], [], []>} : vector<16x4xbf16>, vector<4x512xbf16>, vector<16x512xf32> -> vector<16x512xf32>
    %c5 = arith.constant 5 : index
    %c0_29 = arith.constant 0 : index
    %c0_30 = arith.constant 0 : index
    %28 = vector.load %arg2[%c5, %c0_29, %c0_30] : memref<16x16x4xbf16, #tpu.memory_space<vmem>>, vector<1x16x4xbf16>
    %29 = vector.shape_cast %28 : vector<1x16x4xbf16> to vector<16x4xbf16>
    %c2_31 = arith.constant 2 : index
    %c0_32 = arith.constant 0 : index
    %c0_33 = arith.constant 0 : index
    %30 = vector.load %arg1[%c2_31, %c0_32, %c0_33] : memref<9x4x512xbf16, #tpu.memory_space<vmem>>, vector<1x4x512xbf16>
    %31 = vector.shape_cast %30 : vector<1x4x512xbf16> to vector<4x512xbf16>
    %cst_34 = arith.constant dense<0.000000e+00> : vector<16x512xf32>
    %32 = tpu.matmul %29, %31, %cst_34 {dimension_numbers = #tpu.dot_dimension_numbers<[1], [0], [0], [1], [0, 0, 1, 1], [], []>} : vector<16x4xbf16>, vector<4x512xbf16>, vector<16x512xf32> -> vector<16x512xf32>
    %33 = arith.addf %27, %32 : vector<16x512xf32>
    %c6 = arith.constant 6 : index
    %c0_35 = arith.constant 0 : index
    %c0_36 = arith.constant 0 : index
    %34 = vector.load %arg2[%c6, %c0_35, %c0_36] : memref<16x16x4xbf16, #tpu.memory_space<vmem>>, vector<1x16x4xbf16>
    %35 = vector.shape_cast %34 : vector<1x16x4xbf16> to vector<16x4xbf16>
    %c4_37 = arith.constant 4 : index
    %c0_38 = arith.constant 0 : index
    %c0_39 = arith.constant 0 : index
    %36 = vector.load %arg1[%c4_37, %c0_38, %c0_39] : memref<9x4x512xbf16, #tpu.memory_space<vmem>>, vector<1x4x512xbf16>
    %37 = vector.shape_cast %36 : vector<1x4x512xbf16> to vector<4x512xbf16>
    %cst_40 = arith.constant dense<0.000000e+00> : vector<16x512xf32>
    %38 = tpu.matmul %35, %37, %cst_40 {dimension_numbers = #tpu.dot_dimension_numbers<[1], [0], [0], [1], [0, 0, 1, 1], [], []>} : vector<16x4xbf16>, vector<4x512xbf16>, vector<16x512xf32> -> vector<16x512xf32>
    %39 = arith.addf %33, %38 : vector<16x512xf32>
    %c7 = arith.constant 7 : index
    %c0_41 = arith.constant 0 : index
    %c0_42 = arith.constant 0 : index
    %40 = vector.load %arg2[%c7, %c0_41, %c0_42] : memref<16x16x4xbf16, #tpu.memory_space<vmem>>, vector<1x16x4xbf16>
    %41 = vector.shape_cast %40 : vector<1x16x4xbf16> to vector<16x4xbf16>
    %c5_43 = arith.constant 5 : index
    %c0_44 = arith.constant 0 : index
    %c0_45 = arith.constant 0 : index
    %42 = vector.load %arg1[%c5_43, %c0_44, %c0_45] : memref<9x4x512xbf16, #tpu.memory_space<vmem>>, vector<1x4x512xbf16>
    %43 = vector.shape_cast %42 : vector<1x4x512xbf16> to vector<4x512xbf16>
    %cst_46 = arith.constant dense<0.000000e+00> : vector<16x512xf32>
    %44 = tpu.matmul %41, %43, %cst_46 {dimension_numbers = #tpu.dot_dimension_numbers<[1], [0], [0], [1], [0, 0, 1, 1], [], []>} : vector<16x4xbf16>, vector<4x512xbf16>, vector<16x512xf32> -> vector<16x512xf32>
    %45 = arith.addf %39, %44 : vector<16x512xf32>
    %c8 = arith.constant 8 : index
    %c0_47 = arith.constant 0 : index
    %c0_48 = arith.constant 0 : index
    %46 = vector.load %arg2[%c8, %c0_47, %c0_48] : memref<16x16x4xbf16, #tpu.memory_space<vmem>>, vector<1x16x4xbf16>
    %47 = vector.shape_cast %46 : vector<1x16x4xbf16> to vector<16x4xbf16>
    %c3_49 = arith.constant 3 : index
    %c0_50 = arith.constant 0 : index
    %c0_51 = arith.constant 0 : index
    %48 = vector.load %arg1[%c3_49, %c0_50, %c0_51] : memref<9x4x512xbf16, #tpu.memory_space<vmem>>, vector<1x4x512xbf16>
    %49 = vector.shape_cast %48 : vector<1x4x512xbf16> to vector<4x512xbf16>
    %cst_52 = arith.constant dense<0.000000e+00> : vector<16x512xf32>
    %50 = tpu.matmul %47, %49, %cst_52 {dimension_numbers = #tpu.dot_dimension_numbers<[1], [0], [0], [1], [0, 0, 1, 1], [], []>} : vector<16x4xbf16>, vector<4x512xbf16>, vector<16x512xf32> -> vector<16x512xf32>
    %c9 = arith.constant 9 : index
    %c0_53 = arith.constant 0 : index
    %c0_54 = arith.constant 0 : index
    %51 = vector.load %arg2[%c9, %c0_53, %c0_54] : memref<16x16x4xbf16, #tpu.memory_space<vmem>>, vector<1x16x4xbf16>
    %52 = vector.shape_cast %51 : vector<1x16x4xbf16> to vector<16x4xbf16>
    %c4_55 = arith.constant 4 : index
    %c0_56 = arith.constant 0 : index
    %c0_57 = arith.constant 0 : index
    %53 = vector.load %arg1[%c4_55, %c0_56, %c0_57] : memref<9x4x512xbf16, #tpu.memory_space<vmem>>, vector<1x4x512xbf16>
    %54 = vector.shape_cast %53 : vector<1x4x512xbf16> to vector<4x512xbf16>
    %cst_58 = arith.constant dense<0.000000e+00> : vector<16x512xf32>
    %55 = tpu.matmul %52, %54, %cst_58 {dimension_numbers = #tpu.dot_dimension_numbers<[1], [0], [0], [1], [0, 0, 1, 1], [], []>} : vector<16x4xbf16>, vector<4x512xbf16>, vector<16x512xf32> -> vector<16x512xf32>
    %56 = arith.addf %50, %55 : vector<16x512xf32>
    %c10 = arith.constant 10 : index
    %c0_59 = arith.constant 0 : index
    %c0_60 = arith.constant 0 : index
    %57 = vector.load %arg2[%c10, %c0_59, %c0_60] : memref<16x16x4xbf16, #tpu.memory_space<vmem>>, vector<1x16x4xbf16>
    %58 = vector.shape_cast %57 : vector<1x16x4xbf16> to vector<16x4xbf16>
    %c6_61 = arith.constant 6 : index
    %c0_62 = arith.constant 0 : index
    %c0_63 = arith.constant 0 : index
    %59 = vector.load %arg1[%c6_61, %c0_62, %c0_63] : memref<9x4x512xbf16, #tpu.memory_space<vmem>>, vector<1x4x512xbf16>
    %60 = vector.shape_cast %59 : vector<1x4x512xbf16> to vector<4x512xbf16>
    %cst_64 = arith.constant dense<0.000000e+00> : vector<16x512xf32>
    %61 = tpu.matmul %58, %60, %cst_64 {dimension_numbers = #tpu.dot_dimension_numbers<[1], [0], [0], [1], [0, 0, 1, 1], [], []>} : vector<16x4xbf16>, vector<4x512xbf16>, vector<16x512xf32> -> vector<16x512xf32>
    %62 = arith.addf %56, %61 : vector<16x512xf32>
    %c11 = arith.constant 11 : index
    %c0_65 = arith.constant 0 : index
    %c0_66 = arith.constant 0 : index
    %63 = vector.load %arg2[%c11, %c0_65, %c0_66] : memref<16x16x4xbf16, #tpu.memory_space<vmem>>, vector<1x16x4xbf16>
    %64 = vector.shape_cast %63 : vector<1x16x4xbf16> to vector<16x4xbf16>
    %c7_67 = arith.constant 7 : index
    %c0_68 = arith.constant 0 : index
    %c0_69 = arith.constant 0 : index
    %65 = vector.load %arg1[%c7_67, %c0_68, %c0_69] : memref<9x4x512xbf16, #tpu.memory_space<vmem>>, vector<1x4x512xbf16>
    %66 = vector.shape_cast %65 : vector<1x4x512xbf16> to vector<4x512xbf16>
    %cst_70 = arith.constant dense<0.000000e+00> : vector<16x512xf32>
    %67 = tpu.matmul %64, %66, %cst_70 {dimension_numbers = #tpu.dot_dimension_numbers<[1], [0], [0], [1], [0, 0, 1, 1], [], []>} : vector<16x4xbf16>, vector<4x512xbf16>, vector<16x512xf32> -> vector<16x512xf32>
    %68 = arith.addf %62, %67 : vector<16x512xf32>
    %c12 = arith.constant 12 : index
    %c0_71 = arith.constant 0 : index
    %c0_72 = arith.constant 0 : index
    %69 = vector.load %arg2[%c12, %c0_71, %c0_72] : memref<16x16x4xbf16, #tpu.memory_space<vmem>>, vector<1x16x4xbf16>
    %70 = vector.shape_cast %69 : vector<1x16x4xbf16> to vector<16x4xbf16>
    %c4_73 = arith.constant 4 : index
    %c0_74 = arith.constant 0 : index
    %c0_75 = arith.constant 0 : index
    %71 = vector.load %arg1[%c4_73, %c0_74, %c0_75] : memref<9x4x512xbf16, #tpu.memory_space<vmem>>, vector<1x4x512xbf16>
    %72 = vector.shape_cast %71 : vector<1x4x512xbf16> to vector<4x512xbf16>
    %cst_76 = arith.constant dense<0.000000e+00> : vector<16x512xf32>
    %73 = tpu.matmul %70, %72, %cst_76 {dimension_numbers = #tpu.dot_dimension_numbers<[1], [0], [0], [1], [0, 0, 1, 1], [], []>} : vector<16x4xbf16>, vector<4x512xbf16>, vector<16x512xf32> -> vector<16x512xf32>
    %c13 = arith.constant 13 : index
    %c0_77 = arith.constant 0 : index
    %c0_78 = arith.constant 0 : index
    %74 = vector.load %arg2[%c13, %c0_77, %c0_78] : memref<16x16x4xbf16, #tpu.memory_space<vmem>>, vector<1x16x4xbf16>
    %75 = vector.shape_cast %74 : vector<1x16x4xbf16> to vector<16x4xbf16>
    %c5_79 = arith.constant 5 : index
    %c0_80 = arith.constant 0 : index
    %c0_81 = arith.constant 0 : index
    %76 = vector.load %arg1[%c5_79, %c0_80, %c0_81] : memref<9x4x512xbf16, #tpu.memory_space<vmem>>, vector<1x4x512xbf16>
    %77 = vector.shape_cast %76 : vector<1x4x512xbf16> to vector<4x512xbf16>
    %cst_82 = arith.constant dense<0.000000e+00> : vector<16x512xf32>
    %78 = tpu.matmul %75, %77, %cst_82 {dimension_numbers = #tpu.dot_dimension_numbers<[1], [0], [0], [1], [0, 0, 1, 1], [], []>} : vector<16x4xbf16>, vector<4x512xbf16>, vector<16x512xf32> -> vector<16x512xf32>
    %79 = arith.addf %73, %78 : vector<16x512xf32>
    %c14 = arith.constant 14 : index
    %c0_83 = arith.constant 0 : index
    %c0_84 = arith.constant 0 : index
    %80 = vector.load %arg2[%c14, %c0_83, %c0_84] : memref<16x16x4xbf16, #tpu.memory_space<vmem>>, vector<1x16x4xbf16>
    %81 = vector.shape_cast %80 : vector<1x16x4xbf16> to vector<16x4xbf16>
    %c7_85 = arith.constant 7 : index
    %c0_86 = arith.constant 0 : index
    %c0_87 = arith.constant 0 : index
    %82 = vector.load %arg1[%c7_85, %c0_86, %c0_87] : memref<9x4x512xbf16, #tpu.memory_space<vmem>>, vector<1x4x512xbf16>
    %83 = vector.shape_cast %82 : vector<1x4x512xbf16> to vector<4x512xbf16>
    %cst_88 = arith.constant dense<0.000000e+00> : vector<16x512xf32>
    %84 = tpu.matmul %81, %83, %cst_88 {dimension_numbers = #tpu.dot_dimension_numbers<[1], [0], [0], [1], [0, 0, 1, 1], [], []>} : vector<16x4xbf16>, vector<4x512xbf16>, vector<16x512xf32> -> vector<16x512xf32>
    %85 = arith.addf %79, %84 : vector<16x512xf32>
    %c15 = arith.constant 15 : index
    %c0_89 = arith.constant 0 : index
    %c0_90 = arith.constant 0 : index
    %86 = vector.load %arg2[%c15, %c0_89, %c0_90] : memref<16x16x4xbf16, #tpu.memory_space<vmem>>, vector<1x16x4xbf16>
    %87 = vector.shape_cast %86 : vector<1x16x4xbf16> to vector<16x4xbf16>
    %c8_91 = arith.constant 8 : index
    %c0_92 = arith.constant 0 : index
    %c0_93 = arith.constant 0 : index
    %88 = vector.load %arg1[%c8_91, %c0_92, %c0_93] : memref<9x4x512xbf16, #tpu.memory_space<vmem>>, vector<1x4x512xbf16>
    %89 = vector.shape_cast %88 : vector<1x4x512xbf16> to vector<4x512xbf16>
    %cst_94 = arith.constant dense<0.000000e+00> : vector<16x512xf32>
    %90 = tpu.matmul %87, %89, %cst_94 {dimension_numbers = #tpu.dot_dimension_numbers<[1], [0], [0], [1], [0, 0, 1, 1], [], []>} : vector<16x4xbf16>, vector<4x512xbf16>, vector<16x512xf32> -> vector<16x512xf32>
    %91 = arith.addf %85, %90 : vector<16x512xf32>
    %cst_95 = arith.constant dense<0.000000e+00> : vector<16xf32>
    %92 = vector.multi_reduction <add>, %22, %cst_95 [1] : vector<16x512xf32> to vector<16xf32>
    %93 = vector.shape_cast %92 : vector<16xf32> to vector<16x1xf32>
    %cst_96 = arith.constant dense<0.000000e+00> : vector<16xf32>
    %94 = vector.multi_reduction <add>, %45, %cst_96 [1] : vector<16x512xf32> to vector<16xf32>
    %95 = vector.shape_cast %94 : vector<16xf32> to vector<16x1xf32>
    %96 = arith.addf %93, %95 : vector<16x1xf32>
    %cst_97 = arith.constant dense<0.000000e+00> : vector<16xf32>
    %97 = vector.multi_reduction <add>, %68, %cst_97 [1] : vector<16x512xf32> to vector<16xf32>
    %98 = vector.shape_cast %97 : vector<16xf32> to vector<16x1xf32>
    %99 = arith.addf %96, %98 : vector<16x1xf32>
    %cst_98 = arith.constant dense<0.000000e+00> : vector<16xf32>
    %100 = vector.multi_reduction <add>, %91, %cst_98 [1] : vector<16x512xf32> to vector<16xf32>
    %101 = vector.shape_cast %100 : vector<16xf32> to vector<16x1xf32>
    %102 = arith.addf %99, %101 : vector<16x1xf32>
    %cst_99 = arith.constant 4.8828125E-4 : f32
    %103 = vector.broadcast %cst_99 : f32 to vector<16x1xf32>
    %104 = arith.mulf %102, %103 : vector<16x1xf32>
    %105 = vector.broadcast %104 : vector<16x1xf32> to vector<16x512xf32>
    %106 = arith.subf %22, %105 : vector<16x512xf32>
    %107 = arith.mulf %106, %106 : vector<16x512xf32>
    %cst_100 = arith.constant dense<0.000000e+00> : vector<16xf32>
    %108 = vector.multi_reduction <add>, %107, %cst_100 [1] : vector<16x512xf32> to vector<16xf32>
    %109 = vector.shape_cast %108 : vector<16xf32> to vector<16x1xf32>
    %110 = vector.broadcast %104 : vector<16x1xf32> to vector<16x512xf32>
    %111 = arith.subf %45, %110 : vector<16x512xf32>
    %112 = arith.mulf %111, %111 : vector<16x512xf32>
    %cst_101 = arith.constant dense<0.000000e+00> : vector<16xf32>
    %113 = vector.multi_reduction <add>, %112, %cst_101 [1] : vector<16x512xf32> to vector<16xf32>
    %114 = vector.shape_cast %113 : vector<16xf32> to vector<16x1xf32>
    %115 = arith.addf %109, %114 : vector<16x1xf32>
    %116 = vector.broadcast %104 : vector<16x1xf32> to vector<16x512xf32>
    %117 = arith.subf %68, %116 : vector<16x512xf32>
    %118 = arith.mulf %117, %117 : vector<16x512xf32>
    %cst_102 = arith.constant dense<0.000000e+00> : vector<16xf32>
    %119 = vector.multi_reduction <add>, %118, %cst_102 [1] : vector<16x512xf32> to vector<16xf32>
    %120 = vector.shape_cast %119 : vector<16xf32> to vector<16x1xf32>
    %121 = arith.addf %115, %120 : vector<16x1xf32>
    %122 = vector.broadcast %104 : vector<16x1xf32> to vector<16x512xf32>
    %123 = arith.subf %91, %122 : vector<16x512xf32>
    %124 = arith.mulf %123, %123 : vector<16x512xf32>
    %cst_103 = arith.constant dense<0.000000e+00> : vector<16xf32>
    %125 = vector.multi_reduction <add>, %124, %cst_103 [1] : vector<16x512xf32> to vector<16xf32>
    %126 = vector.shape_cast %125 : vector<16xf32> to vector<16x1xf32>
    %127 = arith.addf %121, %126 : vector<16x1xf32>
    %cst_104 = arith.constant 4.8828125E-4 : f32
    %128 = vector.broadcast %cst_104 : f32 to vector<16x1xf32>
    %129 = arith.mulf %127, %128 : vector<16x1xf32>
    %cst_105 = arith.constant 9.99999974E-6 : f32
    %130 = vector.broadcast %cst_105 : f32 to vector<16x1xf32>
    %131 = arith.addf %129, %130 : vector<16x1xf32>
    %132 = math.rsqrt %131 : vector<16x1xf32>
    %cst_106 = arith.constant 0.000000e+00 : f32
    %133 = vector.broadcast %cst_106 : f32 to vector<16x1xf32>
    %134 = arith.subf %133, %104 : vector<16x1xf32>
    %135 = arith.mulf %134, %132 : vector<16x1xf32>
    %136 = vector.broadcast %132 : vector<16x1xf32> to vector<16x512xf32>
    %137 = arith.mulf %22, %136 : vector<16x512xf32>
    %138 = vector.broadcast %135 : vector<16x1xf32> to vector<16x512xf32>
    %139 = arith.addf %137, %138 : vector<16x512xf32>
    %cst_107 = arith.constant 0.000000e+00 : f32
    %140 = vector.broadcast %cst_107 : f32 to vector<16x512xf32>
    %141 = arith.cmpf oge, %139, %140 : vector<16x512xf32>
    %cst_108 = arith.constant 1.000000e-01 : f32
    %142 = vector.broadcast %cst_108 : f32 to vector<16x512xf32>
    %143 = arith.mulf %142, %139 : vector<16x512xf32>
    %144 = arith.select %141, %139, %143 : vector<16x512xi1>, vector<16x512xf32>
    %c0_109 = arith.constant 0 : index
    %c0_110 = arith.constant 0 : index
    %c0_111 = arith.constant 0 : index
    %145 = vector.load %arg3[%c0_109, %c0_110, %c0_111] : memref<4x16x512xf32, #tpu.memory_space<vmem>>, vector<1x16x512xf32>
    %146 = vector.shape_cast %145 : vector<1x16x512xf32> to vector<16x512xf32>
    %147 = vector.shape_cast %144 : vector<16x512xf32> to vector<1x16x512xf32>
    tpu.vector_store %arg3[%c0_109, %c0_110, %c0_111], %147 {strides = array<i32>} : memref<4x16x512xf32, #tpu.memory_space<vmem>>, vector<1x16x512xf32>,
    %148 = vector.broadcast %132 : vector<16x1xf32> to vector<16x512xf32>
    %149 = arith.mulf %45, %148 : vector<16x512xf32>
    %150 = vector.broadcast %135 : vector<16x1xf32> to vector<16x512xf32>
    %151 = arith.addf %149, %150 : vector<16x512xf32>
    %cst_112 = arith.constant 0.000000e+00 : f32
    %152 = vector.broadcast %cst_112 : f32 to vector<16x512xf32>
    %153 = arith.cmpf oge, %151, %152 : vector<16x512xf32>
    %cst_113 = arith.constant 1.000000e-01 : f32
    %154 = vector.broadcast %cst_113 : f32 to vector<16x512xf32>
    %155 = arith.mulf %154, %151 : vector<16x512xf32>
    %156 = arith.select %153, %151, %155 : vector<16x512xi1>, vector<16x512xf32>
    %c1_114 = arith.constant 1 : index
    %c0_115 = arith.constant 0 : index
    %c0_116 = arith.constant 0 : index
    %157 = vector.load %arg3[%c1_114, %c0_115, %c0_116] : memref<4x16x512xf32, #tpu.memory_space<vmem>>, vector<1x16x512xf32>
    %158 = vector.shape_cast %157 : vector<1x16x512xf32> to vector<16x512xf32>
    %159 = vector.shape_cast %156 : vector<16x512xf32> to vector<1x16x512xf32>
    tpu.vector_store %arg3[%c1_114, %c0_115, %c0_116], %159 {strides = array<i32>} : memref<4x16x512xf32, #tpu.memory_space<vmem>>, vector<1x16x512xf32>,
    %160 = vector.broadcast %132 : vector<16x1xf32> to vector<16x512xf32>
    %161 = arith.mulf %68, %160 : vector<16x512xf32>
    %162 = vector.broadcast %135 : vector<16x1xf32> to vector<16x512xf32>
    %163 = arith.addf %161, %162 : vector<16x512xf32>
    %cst_117 = arith.constant 0.000000e+00 : f32
    %164 = vector.broadcast %cst_117 : f32 to vector<16x512xf32>
    %165 = arith.cmpf oge, %163, %164 : vector<16x512xf32>
    %cst_118 = arith.constant 1.000000e-01 : f32
    %166 = vector.broadcast %cst_118 : f32 to vector<16x512xf32>
    %167 = arith.mulf %166, %163 : vector<16x512xf32>
    %168 = arith.select %165, %163, %167 : vector<16x512xi1>, vector<16x512xf32>
    %c2_119 = arith.constant 2 : index
    %c0_120 = arith.constant 0 : index
    %c0_121 = arith.constant 0 : index
    %169 = vector.load %arg3[%c2_119, %c0_120, %c0_121] : memref<4x16x512xf32, #tpu.memory_space<vmem>>, vector<1x16x512xf32>
    %170 = vector.shape_cast %169 : vector<1x16x512xf32> to vector<16x512xf32>
    %171 = vector.shape_cast %168 : vector<16x512xf32> to vector<1x16x512xf32>
    tpu.vector_store %arg3[%c2_119, %c0_120, %c0_121], %171 {strides = array<i32>} : memref<4x16x512xf32, #tpu.memory_space<vmem>>, vector<1x16x512xf32>,
    %172 = vector.broadcast %132 : vector<16x1xf32> to vector<16x512xf32>
    %173 = arith.mulf %91, %172 : vector<16x512xf32>
    %174 = vector.broadcast %135 : vector<16x1xf32> to vector<16x512xf32>
    %175 = arith.addf %173, %174 : vector<16x512xf32>
    %cst_122 = arith.constant 0.000000e+00 : f32
    %176 = vector.broadcast %cst_122 : f32 to vector<16x512xf32>
    %177 = arith.cmpf oge, %175, %176 : vector<16x512xf32>
    %cst_123 = arith.constant 1.000000e-01 : f32
    %178 = vector.broadcast %cst_123 : f32 to vector<16x512xf32>
    %179 = arith.mulf %178, %175 : vector<16x512xf32>
    %180 = arith.select %177, %175, %179 : vector<16x512xi1>, vector<16x512xf32>
    %c3_124 = arith.constant 3 : index
    %c0_125 = arith.constant 0 : index
    %c0_126 = arith.constant 0 : index
    %181 = vector.load %arg3[%c3_124, %c0_125, %c0_126] : memref<4x16x512xf32, #tpu.memory_space<vmem>>, vector<1x16x512xf32>
    %182 = vector.shape_cast %181 : vector<1x16x512xf32> to vector<16x512xf32>
    %183 = vector.shape_cast %180 : vector<16x512xf32> to vector<1x16x512xf32>
    tpu.vector_store %arg3[%c3_124, %c0_125, %c0_126], %183 {strides = array<i32>} : memref<4x16x512xf32, #tpu.memory_space<vmem>>, vector<1x16x512xf32>,
    return
  }
  func.func @transform_0(%arg0: i32) -> (i32, i32, i32) {
    %c0_i32 = arith.constant 0 : i32
    %c0_i32_0 = arith.constant 0 : i32
    %c0_i32_1 = arith.constant 0 : i32
    %c0_i32_2 = arith.constant 0 : i32
    return %c0_i32, %c0_i32_0, %c0_i32_1 : i32, i32, i32
  }
  func.func @transform_1(%arg0: i32) -> (i32, i32, i32) {
    %c0_i32 = arith.constant 0 : i32
    %c0_i32_0 = arith.constant 0 : i32
    %c0_i32_1 = arith.constant 0 : i32
    return %c0_i32, %arg0, %c0_i32_0 : i32, i32, i32
  }
  func.func @transform_2(%arg0: i32) -> (i32, i32, i32) {
    %c0_i32 = arith.constant 0 : i32
    %c0_i32_0 = arith.constant 0 : i32
    %c0_i32_1 = arith.constant 0 : i32
    return %c0_i32, %arg0, %c0_i32_0 : i32, i32, i32
  }
}

</mosaic_0001>

<bundles_post_ra>
// kernel: upsample_conv.1
= control target key start
LH: loop header
LB: loop body
LE: loop exit
PB: predicated region body
PF: predicated region fallthrough
CT: control target
= control target key end

     0   :  { %s2499_s9 = smov 0   ;;  %s2501_s10 = smov 0   ;;  %s3211_s0 = inlined_call_operand.vmem [shape: bf16[9,4,512], index: 0, kind: input, shape index: {}]   ;;  %s3212_s1 = inlined_call_operand.vmem [shape: bf16[16,32,4], index: 1, kind: input, shape index: {}]   ;;  %s3213_s2 = inlined_call_operand.vmem [shape: f32[4,32,512], index: 2, kind: output, shape index: {}]  }
   0x1   :  { %s2503_s11 = smov 0  }
   0x2 LB: > { %s2207_s12 = sadd.s32 4294967295, %s2482_s11   ;;  %s2516_s13 = sadd.s32 1, %s2482_s11   ;;  %s2482_s11 = sphi %s2503_s11, %s3217_s11   ;;  %s2478_s10 = sphi %s2501_s10, %s3216_s10   ;;  %s2474_s9 = sphi %s2499_s9, %s3215_s9  }
   0x3   : > { %s37_s14 = ssub.s32 %s2482_s11, %s2516_s13  ;;  %s40_s15 = sadd.s32 1, %s2478_s10 }
   0x4   : > { %p38_p0 = scmp.eq.s32.totalorder %s37_s14, 0  ;;  %p47_p1 = scmp.ne.s32.totalorder %s2478_s10, %s2474_s9 }
   0x5   : > { %p48_p2 = scmp.eq.s32.totalorder %s2482_s11, 0  ;;  %p77_p3 = scmp.eq.s32.totalorder %s2207_s12, 1 }
   0x6   : > { %s2527_s16 = scalar_select %p38_p0, %s2478_s10, %s40_s15  }
   0x7   : > { %p49_p4 = por %p48_p2, %p47_p1  ;;  %p2529_p5 = por %p77_p3, %p47_p1 }
   0x8   : > { %p2210_p6 = scmp.ge.s32.totalorder %s2482_s11, 2 }
   0xa   : > { %102 = sbr.rel (%p2210_p6) target bundleno = 35 (0x23), region = 20 }
   0xf   : > { %105 = sbr.rel (!%p49_p4) target bundleno = 35 (0x23), region = 24  ;;  %s107_s18 = sand.u32 (%p49_p4), 1, %s2478_s10  }
  0x10   : > { %s2413_s19 = sshll.u32 (%p49_p4), %s2482_s11, 3  ;;  %s2211_s20 = sshll.u32 (%p49_p4), %s107_s18, 7 }
  0x11   : > { %s2539_s23 = scalar_lea.vmem (%p49_p4), %s3212_s1, %s2413_s19  ;;  %s109_s24 = scalar_lea.vmem (%p49_p4), [#allocation2], %s2211_s20 }
  0x12   : > { %v129_v0 = vld [vmem:[%s2539_s23] sm:$0xff] (%p49_p4)   ;;  %v133_v1 = vld [vmem:[%s2539_s23 + $0x10] sm:$0xff] (%p49_p4)  }
  0x13   : > { %v137_v2 = vld [vmem:[%s2539_s23 + $0x20] sm:$0xff] (%p49_p4)   ;;  %130 = vst [vmem:[%s109_s24] sm:$0xff] (%p49_p4), %v129_v0   ;;  %v141_v3 = vld [vmem:[%s2539_s23 + $0x30] sm:$0xff] (%p49_p4)  }
  0x14   : > { %134 = vst [vmem:[%s109_s24 + $0x8] sm:$0xff] %v133_v1   ;;  %v145_v4 = vld [vmem:[%s2539_s23 + $0x40] sm:$0xff]   ;;  %v149_v5 = vld [vmem:[%s2539_s23 + $0x50] sm:$0xff]  }
  0x15   : > { %138 = vst [vmem:[%s109_s24 + $0x10] sm:$0xff] %v137_v2   ;;  %v153_v6 = vld [vmem:[%s2539_s23 + $0x60] sm:$0xff]   ;;  %v157_v7 = vld [vmem:[%s2539_s23 + $0x70] sm:$0xff]  }
  0x16   : > { %142 = vst [vmem:[%s109_s24 + $0x18] sm:$0xff] %v141_v3   ;;  %v161_v8 = vld [vmem:[%s2539_s23 + $0x80] sm:$0xff]   ;;  %v165_v9 = vld [vmem:[%s2539_s23 + $0x90] sm:$0xff]  }
  0x17   : > { %146 = vst [vmem:[%s109_s24 + $0x20] sm:$0xff] %v145_v4   ;;  %v169_v10 = vld [vmem:[%s2539_s23 + $0xa0] sm:$0xff]   ;;  %v173_v11 = vld [vmem:[%s2539_s23 + $0xb0] sm:$0xff]  }
  0x18   : > { %150 = vst [vmem:[%s109_s24 + $0x28] sm:$0xff] %v149_v5   ;;  %v177_v12 = vld [vmem:[%s2539_s23 + $0xc0] sm:$0xff]   ;;  %v181_v13 = vld [vmem:[%s2539_s23 + $0xd0] sm:$0xff]  }
  0x19   : > { %154 = vst [vmem:[%s109_s24 + $0x30] sm:$0xff] %v153_v6   ;;  %v185_v14 = vld [vmem:[%s2539_s23 + $0xe0] sm:$0xff]   ;;  %v189_v15 = vld [vmem:[%s2539_s23 + $0xf0] sm:$0xff]  }
  0x1a   : > { %158 = vst [vmem:[%s109_s24 + $0x38] sm:$0xff] %v157_v7  }
  0x1b   : > { %162 = vst [vmem:[%s109_s24 + $0x40] sm:$0xff] %v161_v8  }
  0x1c   : > { %166 = vst [vmem:[%s109_s24 + $0x48] sm:$0xff] %v165_v9  }
  0x1d   : > { %170 = vst [vmem:[%s109_s24 + $0x50] sm:$0xff] %v169_v10  }
  0x1e   : > { %174 = vst [vmem:[%s109_s24 + $0x58] sm:$0xff] %v173_v11  }
  0x1f   : > { %178 = vst [vmem:[%s109_s24 + $0x60] sm:$0xff] %v177_v12  }
  0x20   : > { %182 = vst [vmem:[%s109_s24 + $0x68] sm:$0xff] %v181_v13  }
  0x21   : > { %186 = vst [vmem:[%s109_s24 + $0x70] sm:$0xff] %v185_v14  }
  0x22   : > { %190 = vst [vmem:[%s109_s24 + $0x78] sm:$0xff] %v189_v15  }
  0x23 PF: > { %p2214_p7 = scmp.ge.s32.totalorder %s2482_s11, 1  ;;  %p279_p8 = scmp.lt.s32.totalorder %s2482_s11, 3 }
  0x25   : > { %p280_p9 = pnand %p2214_p7, %p279_p8 }
  0x26   : > { %s286_s27 = sand.u32 (!%p280_p9), 1, %s2474_s9  }
  0x27   : > { %283 = sbr.rel (%p280_p9) target bundleno = 798 (0x31e), region = 65  ;;  %s2215_s28 = sshll.u32 (!%p280_p9), %s286_s27, 7 }
  0x28   : > { %s2573_s3 = scalar_lea.vmem (!%p280_p9), [#allocation2], %s2215_s28  ;;  %s2216_s25 = sshll.u32 (!%p280_p9), %s286_s27, 8 }
  0x29   : > { %s3003_s9 = scalar_lea.vmem (!%p280_p9), [#allocation3], %s2216_s25 }
  0x2c   : > { %v2562_v16 = vld [vmem:[%s3211_s0 + $0x8] sm:$0xff]  ;;  %vm332_vm0 = vcmask 1041408   ;;  %v311_v17 = vld [vmem:[%s3211_s0] sm:$0xff]  ;;  %v2415_v23 = vld [vmem:[%s2573_s3 + $0x8] sm:$0xff]  ;;  %vm328_vm1 = vcmask 31744   ;;  %s2431_s26 = sshll.u32 (%p2529_p5), %s2207_s12, 6 }
  0x2d   : > { %323 = vst [vmem:[#allocation1] ss:$4 sm:$0xff] %v2562_v16  ;;  %v2585_v27 = vld [vmem:[%s3211_s0 + $0x18] sm:$0xff]  ;;  %v2414_v36 = vld [vmem:[%s2573_s3] sm:$0xff]  ;;  %v2596_v37 = vld [vmem:[%s3211_s0 + $0x20] sm:$0xff]  ;;  %s3137_s17 = scalar_lea.vmem (%p2529_p5), %s3213_s2, %s2431_s26 }
  0x2e   : > { %v2262_v46 = vld [vmem:[%s3211_s0 + $0x10] sm:$0xff]  ;;  %v2416_v54 = vld [vmem:[%s2573_s3 + $0x10] sm:$0xff]  ;;  %v2417_v0 = vld [vmem:[%s2573_s3 + $0x18] sm:$0xff] }
  0x2f   : > { %v2419_v10 = vld [vmem:[%s2573_s3 + $0x28] sm:$0xff] }
  0x34   : > { %v324_v18 = vld.sshfl [vmem:[#allocation1] sm:$0xff pattern:$0x73625140]  ;;  %v325_v19 = vld.sshfl [vmem:[#allocation1 + $0x8] sm:$0xff pattern:$0x73625140] }
  0x35   : > { %v333_v20 = vsel %vm332_vm0, %v324_v18, 0  ;;  %v335_v21 = vsel %vm332_vm0, %v325_v19, 0  ;;  %v326_v22 = vld.sshfl [vmem:[#allocation1 + $0x10] sm:$0xff pattern:$0x73625140]  ;;  %v2646_v18 = vld [vmem:[%s3211_s0 + $0x28] sm:$0xff] }
  0x36   : > { %348 = vmatpush.bf16.msra.mxu0 %v333_v20  ;;  %362 = vmatpush.bf16.msra.mxu1 %v335_v21  ;;  %v337_v24 = vsel %vm332_vm0, %v326_v22, 0  ;;  %v327_v25 = vld.sshfl [vmem:[#allocation1 + $0x18] sm:$0xff pattern:$0x73625140]  ;;  %v2418_v19 = vld [vmem:[%s2573_s3 + $0x20] sm:$0xff] }
  0x37   : > { %376 = vmatpush.bf16.msra.mxu2 %v337_v24  ;;  %v339_v26 = vsel %vm332_vm0, %v327_v25, 0  ;;  %403 = vst [vmem:[#allocation1] ss:$4 sm:$0xff] %v311_v17 }
  0x38   : > { %390 = vmatpush.bf16.msra.mxu3 %v339_v26 }
  0x39   : > { %2224 = vmatmul.msk.bf16.vlgmr.msra.gmra.mxu0 %vm328_vm1, %v2415_v23  ;;  %2225 = vmatmul.msk.bf16.vlgmr.msra.gmra.mxu1 %vm328_vm1, %v2415_v23 }
  0x3a   : > { %2226 = vmatmul.msk.bf16.vlgmr.msra.gmra.mxu2 %vm328_vm1, %v2415_v23 }
  0x3b   : > { %2227 = vmatmul.msk.bf16.vlgmr.msra.gmra.mxu3 %vm328_vm1, %v2415_v23 }
  0x3e   : > { %v406_v28 = vld.sshfl [vmem:[#allocation1 + $0x10] sm:$0xff pattern:$0x73625140]  ;;  %v407_v29 = vld.sshfl [vmem:[#allocation1 + $0x18] sm:$0xff pattern:$0x73625140] }
  0x3f   : > { %v415_v30 = vsel %vm332_vm0, %v406_v28, 0  ;;  %v417_v31 = vsel %vm332_vm0, %v407_v29, 0  ;;  %v404_v32 = vld.sshfl [vmem:[#allocation1] sm:$0xff pattern:$0x73625140] }
  0x40   : > { %454 = vmatpush.bf16.msrb.mxu2 %v415_v30  ;;  %468 = vmatpush.bf16.msrb.mxu3 %v417_v31  ;;  %v411_v33 = vsel %vm332_vm0, %v404_v32, 0  ;;  %v405_v34 = vld.sshfl [vmem:[#allocation1 + $0x8] sm:$0xff pattern:$0x73625140] }
  0x41   : > { %426 = vmatpush.bf16.msrb.mxu0 %v411_v33  ;;  %v413_v35 = vsel %vm332_vm0, %v405_v34, 0  ;;  %486 = vst [vmem:[#allocation1] ss:$4 sm:$0xff] %v2585_v27  ;;  %v2420_v33 = vld [vmem:[%s2573_s3 + $0x30] sm:$0xff] }
  0x42   : > { %440 = vmatpush.bf16.msrb.mxu1 %v413_v35 }
  0x48   : > { %v489_v38 = vld.sshfl [vmem:[#allocation1 + $0x10] sm:$0xff pattern:$0x73625140]  ;;  %v490_v39 = vld.sshfl [vmem:[#allocation1 + $0x18] sm:$0xff pattern:$0x73625140] }
  0x49   : > { %2232 = vmatmul.msk.bf16.vlgmr.msrb.gmra.mxu0 %vm328_vm1, %v2414_v36  ;;  %2233 = vmatmul.msk.bf16.vlgmr.msrb.gmra.mxu1 %vm328_vm1, %v2414_v36  ;;  %v498_v40 = vsel %vm332_vm0, %v489_v38, 0  ;;  %v500_v41 = vsel %vm332_vm0, %v490_v39, 0  ;;  %v487_v42 = vld.sshfl [vmem:[#allocation1] sm:$0xff pattern:$0x73625140] }
  0x4a   : > { %2234 = vmatmul.msk.bf16.vlgmr.msrb.gmra.mxu2 %vm328_vm1, %v2414_v36  ;;  %551 = vmatpush.bf16.msra.mxu3 %v500_v41  ;;  %v494_v43 = vsel %vm332_vm0, %v487_v42, 0  ;;  %v488_v44 = vld.sshfl [vmem:[#allocation1 + $0x8] sm:$0xff pattern:$0x73625140]  ;;  %v2421_v39 = vld [vmem:[%s2573_s3 + $0x38] sm:$0xff] }
  0x4b   : > { %2235 = vmatmul.msk.bf16.vlgmr.msrb.gmra.mxu3 %vm328_vm1, %v2414_v36  ;;  %537 = vmatpush.bf16.msra.mxu2 %v498_v40  ;;  %v496_v45 = vsel %vm332_vm0, %v488_v44, 0  ;;  %577 = vst [vmem:[#allocation1] ss:$4 sm:$0xff] %v2596_v37 }
  0x4c   : > { %509 = vmatpush.bf16.msra.mxu0 %v494_v43  ;;  %523 = vmatpush.bf16.msra.mxu1 %v496_v45 }
  0x52   : > { %v580_v47 = vld.sshfl [vmem:[#allocation1 + $0x10] sm:$0xff pattern:$0x73625140]  ;;  %v581_v48 = vld.sshfl [vmem:[#allocation1 + $0x18] sm:$0xff pattern:$0x73625140] }
  0x53   : > { %v589_v49 = vsel %vm332_vm0, %v580_v47, 0  ;;  %v591_v50 = vsel %vm332_vm0, %v581_v48, 0  ;;  %v578_v51 = vld.sshfl [vmem:[#allocation1] sm:$0xff pattern:$0x73625140]  ;;  %v2322_v47 = vld [vmem:[%s3211_s0 + $0x30] sm:$0xff] }
  0x54   : > { %628 = vmatpush.bf16.msrb.mxu2 %v589_v49  ;;  %642 = vmatpush.bf16.msrb.mxu3 %v591_v50  ;;  %v585_v52 = vsel %vm332_vm0, %v578_v51, 0  ;;  %v579_v53 = vld.sshfl [vmem:[#allocation1 + $0x8] sm:$0xff pattern:$0x73625140]  ;;  %v2423_v48 = vld [vmem:[%s2573_s3 + $0x48] sm:$0xff] }
  0x55   : > { %600 = vmatpush.bf16.msrb.mxu0 %v585_v52  ;;  %v587_v55 = vsel %vm332_vm0, %v579_v53, 0  ;;  %671 = vst [vmem:[#allocation1] ss:$4 sm:$0xff] %v2262_v46 }
  0x56   : > { %614 = vmatpush.bf16.msrb.mxu1 %v587_v55 }
  0x59   : > { %2243 = vmatmul.msk.bf16.vlgmr.msra.gmra.mxu0 %vm328_vm1, %v2416_v54  ;;  %2244 = vmatmul.msk.bf16.vlgmr.msra.gmra.mxu1 %vm328_vm1, %v2416_v54 }
  0x5a   : > { %2245 = vmatmul.msk.bf16.vlgmr.msra.gmra.mxu2 %vm328_vm1, %v2416_v54 }
  0x5b   : > { %2246 = vmatmul.msk.bf16.vlgmr.msra.gmra.mxu3 %vm328_vm1, %v2416_v54 }
  0x5c   : > { %v674_v56 = vld.sshfl [vmem:[#allocation1 + $0x10] sm:$0xff pattern:$0x73625140]  ;;  %v675_v57 = vld.sshfl [vmem:[#allocation1 + $0x18] sm:$0xff pattern:$0x73625140] }
  0x5d   : > { %v683_v58 = vsel %vm332_vm0, %v674_v56, 0  ;;  %v685_v59 = vsel %vm332_vm0, %v675_v57, 0  ;;  %v672_v60 = vld.sshfl [vmem:[#allocation1] sm:$0xff pattern:$0x73625140] }
  0x5e   : > { %722 = vmatpush.bf16.msra.mxu2 %v683_v58  ;;  %736 = vmatpush.bf16.msra.mxu3 %v685_v59  ;;  %v679_v61 = vsel %vm332_vm0, %v672_v60, 0  ;;  %v673_v62 = vld.sshfl [vmem:[#allocation1 + $0x8] sm:$0xff pattern:$0x73625140] }
  0x5f   : > { %694 = vmatpush.bf16.msra.mxu0 %v679_v61  ;;  %v681_v63 = vsel %vm332_vm0, %v673_v62, 0  ;;  %748 = vst [vmem:[#allocation1] ss:$4 sm:$0xff] %v2562_v16  ;;  %v2333_v62 = vld [vmem:[%s3211_s0 + $0x38] sm:$0xff] }
  0x60   : > { %708 = vmatpush.bf16.msra.mxu1 %v681_v63 }
  0x66   : > { %v751_v1 = vld.sshfl [vmem:[#allocation1 + $0x10] sm:$0xff pattern:$0x73625140]  ;;  %v752_v2 = vld.sshfl [vmem:[#allocation1 + $0x18] sm:$0xff pattern:$0x73625140] }
  0x67   : > { %v749_v3 = vld.sshfl [vmem:[#allocation1] sm:$0xff pattern:$0x73625140]  ;;  %v760_v4 = vsel %vm332_vm0, %v751_v1, 0  ;;  %v762_v7 = vsel %vm332_vm0, %v752_v2, 0  ;;  %v2422_v1 = vld [vmem:[%s2573_s3 + $0x40] sm:$0xff] }
  0x68   : > { %v756_v5 = vsel %vm332_vm0, %v749_v3, 0  ;;  %v750_v6 = vld.sshfl [vmem:[#allocation1 + $0x8] sm:$0xff pattern:$0x73625140] }
  0x69   : > { %2254 = vmatmul.msk.bf16.vlgmr.msrb.gmra.mxu0 %vm328_vm1, %v2417_v0  ;;  %2255 = vmatmul.msk.bf16.vlgmr.msrb.gmra.mxu1 %vm328_vm1, %v2417_v0  ;;  %v758_v8 = vsel %vm332_vm0, %v750_v6, 0  ;;  %828 = vst [vmem:[#allocation1] ss:$4 sm:$0xff] %v2596_v37 }
  0x6a   : > { %2256 = vmatmul.msk.bf16.vlgmr.msrb.gmra.mxu2 %vm328_vm1, %v2417_v0  ;;  %771 = vmatpush.bf16.msrb.mxu0 %v756_v5 }
  0x6b   : > { %2257 = vmatmul.msk.bf16.vlgmr.msrb.gmra.mxu3 %vm328_vm1, %v2417_v0  ;;  %799 = vmatpush.bf16.msrb.mxu2 %v760_v4 }
  0x6c   : > { %813 = vmatpush.bf16.msrb.mxu3 %v762_v7  ;;  %785 = vmatpush.bf16.msrb.mxu1 %v758_v8 }
  0x70   : > { %v829_v9 = vld.sshfl [vmem:[#allocation1] sm:$0xff pattern:$0x73625140]  ;;  %v831_v11 = vld.sshfl [vmem:[#allocation1 + $0x10] sm:$0xff pattern:$0x73625140] }
  0x71   : > { %v832_v12 = vld.sshfl [vmem:[#allocation1 + $0x18] sm:$0xff pattern:$0x73625140]  ;;  %v830_v13 = vld.sshfl [vmem:[#allocation1 + $0x8] sm:$0xff pattern:$0x73625140] }
  0x72   : > { %v836_v14 = vsel %vm332_vm0, %v829_v9, 0  ;;  %v840_v15 = vsel %vm332_vm0, %v831_v11, 0  ;;  %v842_v16 = vsel %vm332_vm0, %v832_v12, 0  ;;  %v838_v17 = vsel %vm332_vm0, %v830_v13, 0  ;;  %919 = vst [vmem:[#allocation1] ss:$4 sm:$0xff] %v2646_v18 }
  0x79   : > { %2267 = vmatmul.msk.bf16.vlgmr.msra.gmra.mxu0 %vm328_vm1, %v2419_v10  ;;  %2268 = vmatmul.msk.bf16.vlgmr.msra.gmra.mxu1 %vm328_vm1, %v2419_v10  ;;  %v922_v20 = vld.sshfl [vmem:[#allocation1 + $0x10] sm:$0xff pattern:$0x73625140]  ;;  %v920_v21 = vld.sshfl [vmem:[#allocation1] sm:$0xff pattern:$0x73625140] }
  0x7a   : > { %2269 = vmatmul.msk.bf16.vlgmr.msra.gmra.mxu2 %vm328_vm1, %v2419_v10  ;;  %851 = vmatpush.bf16.msra.mxu0 %v836_v14  ;;  %v923_v22 = vld.sshfl [vmem:[#allocation1 + $0x18] sm:$0xff pattern:$0x73625140]  ;;  %v921_v23 = vld.sshfl [vmem:[#allocation1 + $0x8] sm:$0xff pattern:$0x73625140] }
  0x7b   : > { %2270 = vmatmul.msk.bf16.vlgmr.msra.gmra.mxu3 %vm328_vm1, %v2419_v10  ;;  %879 = vmatpush.bf16.msra.mxu2 %v840_v15  ;;  %1010 = vst [vmem:[#allocation1] ss:$4 sm:$0xff] %v2596_v37  ;;  %v927_v24 = vsel %vm332_vm0, %v920_v21, 0  ;;  %v931_v25 = vsel %vm332_vm0, %v922_v20, 0  ;;  %v933_v26 = vsel %vm332_vm0, %v923_v22, 0  ;;  %v929_v28 = vsel %vm332_vm0, %v921_v23, 0 }
  0x7c   : > { %893 = vmatpush.bf16.msra.mxu3 %v842_v16  ;;  %865 = vmatpush.bf16.msra.mxu1 %v838_v17  ;;  %v2424_v22 = vld [vmem:[%s2573_s3 + $0x50] sm:$0xff] }
  0x82   : > { %v1013_v29 = vld.sshfl [vmem:[#allocation1 + $0x10] sm:$0xff pattern:$0x73625140]  ;;  %v1014_v30 = vld.sshfl [vmem:[#allocation1 + $0x18] sm:$0xff pattern:$0x73625140] }
  0x83   : > { %v1011_v31 = vld.sshfl [vmem:[#allocation1] sm:$0xff pattern:$0x73625140]  ;;  %v1012_v32 = vld.sshfl [vmem:[#allocation1 + $0x8] sm:$0xff pattern:$0x73625140] }
  0x84   : > { %1087 = vst [vmem:[#allocation1] ss:$4 sm:$0xff] %v2585_v27  ;;  %v1018_v34 = vsel %vm332_vm0, %v1011_v31, 0  ;;  %v1022_v35 = vsel %vm332_vm0, %v1013_v29, 0  ;;  %v1024_v36 = vsel %vm332_vm0, %v1014_v30, 0  ;;  %v1020_v38 = vsel %vm332_vm0, %v1012_v32, 0 }
  0x89   : > { %2275 = vmatmul.msk.bf16.vlgmr.msrb.gmra.mxu0 %vm328_vm1, %v2418_v19  ;;  %2276 = vmatmul.msk.bf16.vlgmr.msrb.gmra.mxu1 %vm328_vm1, %v2418_v19 }
  0x8a   : > { %2277 = vmatmul.msk.bf16.vlgmr.msrb.gmra.mxu2 %vm328_vm1, %v2418_v19  ;;  %942 = vmatpush.bf16.msrb.mxu0 %v927_v24 }
  0x8b   : > { %2278 = vmatmul.msk.bf16.vlgmr.msrb.gmra.mxu3 %vm328_vm1, %v2418_v19  ;;  %970 = vmatpush.bf16.msrb.mxu2 %v931_v25  ;;  %v1088_v27 = vld.sshfl [vmem:[#allocation1] sm:$0xff pattern:$0x73625140]  ;;  %v1090_v40 = vld.sshfl [vmem:[#allocation1 + $0x10] sm:$0xff pattern:$0x73625140] }
  0x8c   : > { %984 = vmatpush.bf16.msrb.mxu3 %v933_v26  ;;  %956 = vmatpush.bf16.msrb.mxu1 %v929_v28  ;;  %v1091_v41 = vld.sshfl [vmem:[#allocation1 + $0x18] sm:$0xff pattern:$0x73625140]  ;;  %v1089_v42 = vld.sshfl [vmem:[#allocation1 + $0x8] sm:$0xff pattern:$0x73625140] }
  0x8d   : > { %v1095_v43 = vsel %vm332_vm0, %v1088_v27, 0  ;;  %v1099_v44 = vsel %vm332_vm0, %v1090_v40, 0  ;;  %v1101_v45 = vsel %vm332_vm0, %v1091_v41, 0  ;;  %v1097_v46 = vsel %vm332_vm0, %v1089_v42, 0  ;;  %1170 = vst [vmem:[#allocation1] ss:$4 sm:$0xff] %v2322_v47 }
  0x94   : > { %v1173_v51 = vld.sshfl [vmem:[#allocation1 + $0x10] sm:$0xff pattern:$0x73625140]  ;;  %v1174_v52 = vld.sshfl [vmem:[#allocation1 + $0x18] sm:$0xff pattern:$0x73625140] }
  0x95   : > { %v1171_v53 = vld.sshfl [vmem:[#allocation1] sm:$0xff pattern:$0x73625140]  ;;  %v1182_v54 = vsel %vm332_vm0, %v1173_v51, 0  ;;  %v1184_v57 = vsel %vm332_vm0, %v1174_v52, 0 }
  0x96   : > { %v1178_v55 = vsel %vm332_vm0, %v1171_v53, 0  ;;  %v1172_v56 = vld.sshfl [vmem:[#allocation1 + $0x8] sm:$0xff pattern:$0x73625140] }
  0x97   : > { %v1180_v58 = vsel %vm332_vm0, %v1172_v56, 0  ;;  %1261 = vst [vmem:[#allocation1] ss:$4 sm:$0xff] %v2333_v62 }
  0x99   : > { %2285 = vmatmul.msk.bf16.vlgmr.msra.gmra.mxu0 %vm328_vm1, %v2420_v33  ;;  %2286 = vmatmul.msk.bf16.vlgmr.msra.gmra.mxu1 %vm328_vm1, %v2420_v33 }
  0x9a   : > { %2287 = vmatmul.msk.bf16.vlgmr.msra.gmra.mxu2 %vm328_vm1, %v2420_v33  ;;  %1033 = vmatpush.bf16.msra.mxu0 %v1018_v34 }
  0x9b   : > { %2288 = vmatmul.msk.bf16.vlgmr.msra.gmra.mxu3 %vm328_vm1, %v2420_v33  ;;  %1061 = vmatpush.bf16.msra.mxu2 %v1022_v35 }
  0x9c   : > { %1075 = vmatpush.bf16.msra.mxu3 %v1024_v36  ;;  %1047 = vmatpush.bf16.msra.mxu1 %v1020_v38 }
  0x9e   : > { %v1264_v4 = vld.sshfl [vmem:[#allocation1 + $0x10] sm:$0xff pattern:$0x73625140]  ;;  %v1265_v5 = vld.sshfl [vmem:[#allocation1 + $0x18] sm:$0xff pattern:$0x73625140] }
  0x9f   : > { %v1262_v7 = vld.sshfl [vmem:[#allocation1] sm:$0xff pattern:$0x73625140]  ;;  %v1273_v8 = vsel %vm332_vm0, %v1264_v4, 0  ;;  %v1275_v11 = vsel %vm332_vm0, %v1265_v5, 0 }
  0xa0   : > { %v1269_v9 = vsel %vm332_vm0, %v1262_v7, 0  ;;  %v1263_v10 = vld.sshfl [vmem:[#allocation1 + $0x8] sm:$0xff pattern:$0x73625140] }
  0xa1   : > { %v1271_v12 = vsel %vm332_vm0, %v1263_v10, 0  ;;  %1352 = vst [vmem:[#allocation1] ss:$4 sm:$0xff] %v2646_v18 }
  0xa8   : > { %v1355_v17 = vld.sshfl [vmem:[#allocation1 + $0x10] sm:$0xff pattern:$0x73625140]  ;;  %v1356_v19 = vld.sshfl [vmem:[#allocation1 + $0x18] sm:$0xff pattern:$0x73625140] }
  0xa9   : > { %2296 = vmatmul.msk.bf16.vlgmr.msrb.gmra.mxu0 %vm328_vm1, %v2421_v39  ;;  %2297 = vmatmul.msk.bf16.vlgmr.msrb.gmra.mxu1 %vm328_vm1, %v2421_v39  ;;  %v1353_v20 = vld.sshfl [vmem:[#allocation1] sm:$0xff pattern:$0x73625140]  ;;  %v1354_v21 = vld.sshfl [vmem:[#allocation1 + $0x8] sm:$0xff pattern:$0x73625140] }
  0xaa   : > { %2298 = vmatmul.msk.bf16.vlgmr.msrb.gmra.mxu2 %vm328_vm1, %v2421_v39  ;;  %1110 = vmatpush.bf16.msrb.mxu0 %v1095_v43  ;;  %1429 = vst [vmem:[#allocation1] ss:$4 sm:$0xff] %v2596_v37  ;;  %v1360_v26 = vsel %vm332_vm0, %v1353_v20, 0  ;;  %v1364_v28 = vsel %vm332_vm0, %v1355_v17, 0  ;;  %v1366_v29 = vsel %vm332_vm0, %v1356_v19, 0  ;;  %v1362_v30 = vsel %vm332_vm0, %v1354_v21, 0 }
  0xab   : > { %2299 = vmatmul.msk.bf16.vlgmr.msrb.gmra.mxu3 %vm328_vm1, %v2421_v39  ;;  %1138 = vmatpush.bf16.msrb.mxu2 %v1099_v44  ;;  %v2425_v39 = vld [vmem:[%s2573_s3 + $0x58] sm:$0xff] }
  0xac   : > { %1152 = vmatpush.bf16.msrb.mxu3 %v1101_v45  ;;  %1124 = vmatpush.bf16.msrb.mxu1 %v1097_v46 }
  0xb1   : > { %v1432_v34 = vld.sshfl [vmem:[#allocation1 + $0x10] sm:$0xff pattern:$0x73625140]  ;;  %v1433_v35 = vld.sshfl [vmem:[#allocation1 + $0x18] sm:$0xff pattern:$0x73625140] }
  0xb2   : > { %v1430_v36 = vld.sshfl [vmem:[#allocation1] sm:$0xff pattern:$0x73625140]  ;;  %v1431_v38 = vld.sshfl [vmem:[#allocation1 + $0x8] sm:$0xff pattern:$0x73625140] }
  0xb3   : > { %1509 = vst [vmem:[#allocation1] ss:$4 sm:$0xff] %v2333_v62  ;;  %v1437_v45 = vsel %vm332_vm0, %v1430_v36, 0  ;;  %v1443_v51 = vsel %vm332_vm0, %v1433_v35, 0  ;;  %v1439_v52 = vsel %vm332_vm0, %v1431_v38, 0  ;;  %v2426_v36 = vld [vmem:[%s2573_s3 + $0x60] sm:$0xff] }
  0xb6   : > { %v2682_v49 = vpop.f32.mrf.mxu0  ;;  %v2684_v50 = vpop.f32.mrf.mxu1 }
  0xb9   : > { %2308 = vmatmul.msk.bf16.vlgmr.msra.gmra.mxu0 %vm328_vm1, %v2423_v48  ;;  %2309 = vmatmul.msk.bf16.vlgmr.msra.gmra.mxu1 %vm328_vm1, %v2423_v48 }
  0xba   : > { %2310 = vmatmul.msk.bf16.vlgmr.msra.gmra.mxu2 %vm328_vm1, %v2423_v48  ;;  %1193 = vmatpush.bf16.msra.mxu0 %v1178_v55 }
  0xbb   : > { %2311 = vmatmul.msk.bf16.vlgmr.msra.gmra.mxu3 %vm328_vm1, %v2423_v48  ;;  %1221 = vmatpush.bf16.msra.mxu2 %v1182_v54  ;;  %v1441_v48 = vsel %vm332_vm0, %v1432_v34, 0 }
  0xbc   : > { %1235 = vmatpush.bf16.msra.mxu3 %v1184_v57  ;;  %1207 = vmatpush.bf16.msra.mxu1 %v1180_v58 }
  0xbd   : > { %v2694_v59 = vpop.f32.mrf.mxu2 }
  0xbe   : > { %v2696_v60 = vpop.f32.mrf.mxu3  ;;  %v2698_v61 = vpop.f32.mrf.mxu0 }
  0xbf   : > { %v2703_v63 = vpop.f32.mrf.mxu1 }
  0xc5   : > { %v2705_v0 = vpop.f32.mrf.mxu2 }
  0xc6   : > { %v2708_v2 = vpop.f32.mrf.mxu3  ;;  %v428_v3 = vpop.f32.mrf.mxu0 }
  0xc7   : > { %v442_v6 = vpop.f32.mrf.mxu1  ;;  %v429_v40 = vadd.f32 %v428_v3, %v2682_v49 }
  0xc8   : > { %v443_v41 = vadd.f32 %v442_v6, %v2684_v50 }
  0xc9   : > { %2316 = vmatmul.msk.bf16.vlgmr.msrb.gmra.mxu0 %vm328_vm1, %v2422_v1  ;;  %2317 = vmatmul.msk.bf16.vlgmr.msrb.gmra.mxu1 %vm328_vm1, %v2422_v1 }
  0xca   : > { %2318 = vmatmul.msk.bf16.vlgmr.msrb.gmra.mxu2 %vm328_vm1, %v2422_v1  ;;  %1284 = vmatpush.bf16.msrb.mxu0 %v1269_v9 }
  0xcb   : > { %2319 = vmatmul.msk.bf16.vlgmr.msrb.gmra.mxu3 %vm328_vm1, %v2422_v1  ;;  %1312 = vmatpush.bf16.msrb.mxu2 %v1273_v8 }
  0xcc   : > { %1326 = vmatpush.bf16.msrb.mxu3 %v1275_v11  ;;  %1298 = vmatpush.bf16.msrb.mxu1 %v1271_v12 }
  0xcd   : > { %v456_v13 = vpop.f32.mrf.mxu2 }
  0xce   : > { %v470_v14 = vpop.f32.mrf.mxu3  ;;  %v430_v15 = vpop.f32.mrf.mxu0  ;;  %v457_v49 = vadd.f32 %v456_v13, %v2694_v59  ;;  %v1510_v13 = vld.sshfl [vmem:[#allocation1] sm:$0xff pattern:$0x73625140] }
  0xcf   : > { %v444_v16 = vpop.f32.mrf.mxu1  ;;  %v471_v54 = vadd.f32 %v470_v14, %v2696_v60  ;;  %v431_v56 = vadd.f32 %v430_v15, %v2698_v61  ;;  %v2427_v15 = vld [vmem:[%s2573_s3 + $0x68] sm:$0xff] }
  0xd0   : > { %v445_v58 = vadd.f32 %v444_v16, %v2703_v63  ;;  %v1512_v16 = vld.sshfl [vmem:[#allocation1 + $0x10] sm:$0xff pattern:$0x73625140] }
  0xd5   : > { %v2720_v18 = vpop.f32.mrf.mxu2 }
  0xd6   : > { %v2723_v23 = vpop.f32.mrf.mxu3  ;;  %v511_v24 = vpop.f32.mrf.mxu0  ;;  %v459_v61 = vadd.f32 %v2720_v18, %v2705_v0  ;;  %v1513_v18 = vld.sshfl [vmem:[#allocation1 + $0x18] sm:$0xff pattern:$0x73625140] }
  0xd7   : > { %v525_v25 = vpop.f32.mrf.mxu1  ;;  %v558_v46 = vadd.f32 %v511_v24, %v429_v40  ;;  %v473_v11 = vadd.f32 %v2723_v23, %v2708_v2  ;;  %v1517_v2 = vsel %vm332_vm0, %v1510_v13, 0  ;;  %v1511_v23 = vld.sshfl [vmem:[#allocation1 + $0x8] sm:$0xff pattern:$0x73625140] }
  0xd8   : > { %v559_v47 = vadd.f32 %v525_v25, %v443_v41 }
  0xd9   : > { %2327 = vmatmul.msk.bf16.vlgmr.msra.gmra.mxu0 %vm328_vm1, %v2424_v22  ;;  %2328 = vmatmul.msk.bf16.vlgmr.msra.gmra.mxu1 %vm328_vm1, %v2424_v22 }
  0xda   : > { %2329 = vmatmul.msk.bf16.vlgmr.msra.gmra.mxu2 %vm328_vm1, %v2424_v22  ;;  %1375 = vmatpush.bf16.msra.mxu0 %v1360_v26  ;;  %v1521_v26 = vsel %vm332_vm0, %v1512_v16, 0 }
  0xdb   : > { %2330 = vmatmul.msk.bf16.vlgmr.msra.gmra.mxu3 %vm328_vm1, %v2424_v22  ;;  %1403 = vmatpush.bf16.msra.mxu2 %v1364_v28  ;;  %v1523_v28 = vsel %vm332_vm0, %v1513_v18, 0 }
  0xdc   : > { %1417 = vmatpush.bf16.msra.mxu3 %v1366_v29  ;;  %1389 = vmatpush.bf16.msra.mxu1 %v1362_v30  ;;  %v1519_v30 = vsel %vm332_vm0, %v1511_v23, 0 }
  0xdd   : > { %v539_v37 = vpop.f32.mrf.mxu2 }
  0xde   : > { %v553_v31 = vpop.f32.mrf.mxu3  ;;  %v513_v32 = vpop.f32.mrf.mxu0  ;;  %v560_v55 = vadd.f32 %v539_v37, %v457_v49 }
  0xdf   : > { %v527_v33 = vpop.f32.mrf.mxu1  ;;  %v561_v59 = vadd.f32 %v553_v31, %v471_v54  ;;  %v562_v6 = vadd.f32 %v513_v32, %v431_v56 }
  0xe0   : > { %v563_v60 = vadd.f32 %v527_v33, %v445_v58  ;;  %v2374_v33 = vld [vmem:[%s3211_s0 + $0x40] sm:$0xff] }
  0xe1   : > { %1600 = vst [vmem:[#allocation1] ss:$4 sm:$0xff] %v2374_v33 }
  0xe5   : > { %v541_v27 = vpop.f32.mrf.mxu2 }
  0xe6   : > { %v555_v42 = vpop.f32.mrf.mxu3  ;;  %v602_v43 = vpop.f32.mrf.mxu0  ;;  %v564_v12 = vadd.f32 %v541_v27, %v459_v61 }
  0xe7   : > { %v616_v44 = vpop.f32.mrf.mxu1  ;;  %v2743_v50 = vadd.f32 %v602_v43, %v558_v46  ;;  %v565_v17 = vadd.f32 %v555_v42, %v473_v11 }
  0xe8   : > { %v2745_v53 = vadd.f32 %v616_v44, %v559_v47  ;;  %v1604_v40 = vld.sshfl [vmem:[#allocation1 + $0x18] sm:$0xff pattern:$0x73625140]  ;;  %v1601_v42 = vld.sshfl [vmem:[#allocation1] sm:$0xff pattern:$0x73625140] }
  0xe9   : > { %2338 = vmatmul.msk.bf16.vlgmr.msrb.gmra.mxu0 %vm328_vm1, %v2425_v39  ;;  %2339 = vmatmul.msk.bf16.vlgmr.msrb.gmra.mxu1 %vm328_vm1, %v2425_v39  ;;  %v1608_v44 = vsel %vm332_vm0, %v1601_v42, 0  ;;  %v1614_v46 = vsel %vm332_vm0, %v1604_v40, 0 }
  0xea   : > { %2340 = vmatmul.msk.bf16.vlgmr.msrb.gmra.mxu2 %vm328_vm1, %v2425_v39  ;;  %1452 = vmatpush.bf16.msrb.mxu0 %v1437_v45  ;;  %v1680_v4 = vadd.f32 %v2745_v53, %v2743_v50  ;;  %v1602_v45 = vld.sshfl [vmem:[#allocation1 + $0x8] sm:$0xff pattern:$0x73625140] }
  0xeb   : > { %2341 = vmatmul.msk.bf16.vlgmr.msrb.gmra.mxu3 %vm328_vm1, %v2425_v39  ;;  %1480 = vmatpush.bf16.msrb.mxu2 %v1441_v48  ;;  %v1603_v39 = vld.sshfl [vmem:[#allocation1 + $0x10] sm:$0xff pattern:$0x73625140]  ;;  %v1610_v47 = vsel %vm332_vm0, %v1602_v45, 0 }
  0xec   : > { %1494 = vmatpush.bf16.msrb.mxu3 %v1443_v51  ;;  %1466 = vmatpush.bf16.msrb.mxu1 %v1439_v52  ;;  %v1612_v43 = vsel %vm332_vm0, %v1603_v39, 0 }
  0xed   : > { %v630_v57 = vpop.f32.mrf.mxu2 }
  0xee   : > { %v2752_v62 = vadd.f32 %v630_v57, %v560_v55  ;;  %v644_v1 = vpop.f32.mrf.mxu3  ;;  %v604_v3 = vpop.f32.mrf.mxu0  ;;  %v2428_v55 = vld [vmem:[%s2573_s3 + $0x70] sm:$0xff] }
  0xef   : > { %v618_v5 = vpop.f32.mrf.mxu1  ;;  %v2756_v7 = vadd.f32 %v644_v1, %v561_v59  ;;  %v2761_v63 = vadd.f32 %v604_v3, %v562_v6  ;;  %v2429_v6 = vld [vmem:[%s2573_s3 + $0x78] sm:$0xff] }
  0xf0   : > { %v1681_v8 = vadd.f32 %v1680_v4, %v2752_v62  ;;  %v2763_v9 = vadd.f32 %v618_v5, %v563_v60 }
  0xf2   : > { %v1682_v10 = vadd.f32 %v1681_v8, %v2756_v7  ;;  %v1685_v21 = vadd.f32 %v2763_v9, %v2761_v63 }
  0xf4   : > { %1683 = vadd.xlane.f32.xlu0 %v1682_v10 }
  0xf5   : > { %v632_v14 = vpop.f32.mrf.mxu2 }
  0xf6   : > { %v2769_v19 = vadd.f32 %v632_v14, %v564_v12  ;;  %v646_v20 = vpop.f32.mrf.mxu3  ;;  %v2771_v0 = vpop.f32.mrf.mxu0 }
  0xf7   : > { %v2775_v22 = vpop.f32.mrf.mxu1  ;;  %v2778_v24 = vadd.f32 %v646_v20, %v565_v17 }
  0xf8   : > { %v1686_v25 = vadd.f32 %v1685_v21, %v2769_v19 }
  0xf9   : > { %2350 = vmatmul.msk.bf16.vlgmr.msra.gmra.mxu0 %vm328_vm1, %v2427_v15  ;;  %2351 = vmatmul.msk.bf16.vlgmr.msra.gmra.mxu1 %vm328_vm1, %v2427_v15 }
  0xfa   : > { %2352 = vmatmul.msk.bf16.vlgmr.msra.gmra.mxu2 %vm328_vm1, %v2427_v15  ;;  %v1687_v29 = vadd.f32 %v1686_v25, %v2778_v24  ;;  %1532 = vmatpush.bf16.msra.mxu0 %v1517_v2 }
  0xfb   : > { %2353 = vmatmul.msk.bf16.vlgmr.msra.gmra.mxu3 %vm328_vm1, %v2427_v15  ;;  %1560 = vmatpush.bf16.msra.mxu2 %v1521_v26 }
  0xfc   : > { %1688 = vadd.xlane.f32.xlu0 %v1687_v29  ;;  %1574 = vmatpush.bf16.msra.mxu3 %v1523_v28 }
  0xfd   : > { %v724_v37 = vpop.f32.mrf.mxu2  ;;  %1546 = vmatpush.bf16.msra.mxu1 %v1519_v30 }
  0xfe   : > { %v738_v31 = vpop.f32.mrf.mxu3  ;;  %v698_v32 = vpop.f32.mrf.mxu0 }
  0xff   : > { %v712_v34 = vpop.f32.mrf.mxu1 }
 0x105   : > { %v2792_v35 = vpop.f32.mrf.mxu2 }
 0x106   : > { %v2795_v38 = vpop.f32.mrf.mxu3  ;;  %v773_v27 = vpop.f32.mrf.mxu0 }
 0x107   : > { %v787_v41 = vpop.f32.mrf.mxu1  ;;  %v774_v60 = vadd.f32 %v773_v27, %v2771_v0 }
 0x108   : > { %v788_v8 = vadd.f32 %v787_v41, %v2775_v22 }
 0x109   : > { %2358 = vmatmul.msk.bf16.vlgmr.msrb.gmra.mxu0 %vm328_vm1, %v2426_v36  ;;  %2359 = vmatmul.msk.bf16.vlgmr.msrb.gmra.mxu1 %vm328_vm1, %v2426_v36 }
 0x10a   : > { %2360 = vmatmul.msk.bf16.vlgmr.msrb.gmra.mxu2 %vm328_vm1, %v2426_v36  ;;  %1623 = vmatpush.bf16.msrb.mxu0 %v1608_v44 }
 0x10b   : > { %2361 = vmatmul.msk.bf16.vlgmr.msrb.gmra.mxu3 %vm328_vm1, %v2426_v36  ;;  %1651 = vmatpush.bf16.msrb.mxu2 %v1612_v43 }
 0x10c   : > { %1665 = vmatpush.bf16.msrb.mxu3 %v1614_v46  ;;  %1637 = vmatpush.bf16.msrb.mxu1 %v1610_v47 }
 0x10d   : > { %v801_v48 = vpop.f32.mrf.mxu2 }
 0x10e   : > { %v815_v51 = vpop.f32.mrf.mxu3  ;;  %v775_v52 = vpop.f32.mrf.mxu0  ;;  %v802_v14 = vadd.f32 %v801_v48, %v724_v37 }
 0x10f   : > { %v789_v49 = vpop.f32.mrf.mxu1  ;;  %v816_v17 = vadd.f32 %v815_v51, %v738_v31  ;;  %v776_v0 = vadd.f32 %v775_v52, %v698_v32 }
 0x110   : > { %v790_v18 = vadd.f32 %v789_v49, %v712_v34 }
 0x115   : > { %v803_v54 = vpop.f32.mrf.mxu2 }
 0x116   : > { %v817_v56 = vpop.f32.mrf.mxu3  ;;  %v853_v57 = vpop.f32.mrf.mxu0  ;;  %v804_v31 = vadd.f32 %v803_v54, %v2792_v35 }
 0x117   : > { %v867_v58 = vpop.f32.mrf.mxu1  ;;  %v900_v12 = vadd.f32 %v853_v57, %v774_v60  ;;  %v818_v27 = vadd.f32 %v817_v56, %v2795_v38 }
 0x118   : > { %v901_v13 = vadd.f32 %v867_v58, %v788_v8 }
 0x119   : > { %2368 = vmatmul.msk.bf16.vlgmr.msra.gmra.mxu0 %vm328_vm1, %v2428_v55  ;;  %2369 = vmatmul.msk.bf16.vlgmr.msra.gmra.mxu1 %vm328_vm1, %v2428_v55 }
 0x11a   : > { %2370 = vmatmul.msk.bf16.vlgmr.msra.gmra.mxu2 %vm328_vm1, %v2428_v55 }
 0x11b   : > { %2371 = vmatmul.msk.bf16.vlgmr.msra.gmra.mxu3 %vm328_vm1, %v2428_v55 }
 0x11d   : > { %v881_v59 = vpop.f32.mrf.mxu2 }
 0x11e   : > { %v895_v1 = vpop.f32.mrf.mxu3  ;;  %v855_v3 = vpop.f32.mrf.mxu0  ;;  %v902_v20 = vadd.f32 %v881_v59, %v802_v14 }
 0x11f   : > { %v869_v4 = vpop.f32.mrf.mxu1  ;;  %v903_v22 = vadd.f32 %v895_v1, %v816_v17  ;;  %v904_v29 = vadd.f32 %v855_v3, %v776_v0 }
 0x120   : > { %v905_v30 = vadd.f32 %v869_v4, %v790_v18 }
 0x125   : > { %v883_v5 = vpop.f32.mrf.mxu2 }
 0x126   : > { %v897_v61 = vpop.f32.mrf.mxu3  ;;  %v944_v10 = vpop.f32.mrf.mxu0  ;;  %v906_v39 = vadd.f32 %v883_v5, %v804_v31 }
 0x127   : > { %v958_v11 = vpop.f32.mrf.mxu1  ;;  %v2815_v15 = vadd.f32 %v944_v10, %v900_v12  ;;  %v907_v41 = vadd.f32 %v897_v61, %v818_v27 }
 0x128   : > { %v2817_v16 = vadd.f32 %v958_v11, %v901_v13 }
 0x129   : > { %2379 = vmatmul.msk.bf16.vlgmr.msrb.gmra.mxu0 %vm328_vm1, %v2429_v6  ;;  %2380 = vmatmul.msk.bf16.vlgmr.msrb.gmra.mxu1 %vm328_vm1, %v2429_v6 }
 0x12a   : > { %2381 = vmatmul.msk.bf16.vlgmr.msrb.gmra.mxu2 %vm328_vm1, %v2429_v6  ;;  %v1690_v26 = vadd.f32 %v2817_v16, %v2815_v15 }
 0x12b   : > { %2382 = vmatmul.msk.bf16.vlgmr.msrb.gmra.mxu3 %vm328_vm1, %v2429_v6 }
 0x12d   : > { %v972_v21 = vpop.f32.mrf.mxu2 }
 0x12e   : > { %v2821_v2 = vadd.f32 %v972_v21, %v902_v20  ;;  %v986_v23 = vpop.f32.mrf.mxu3  ;;  %v946_v25 = vpop.f32.mrf.mxu0 }
 0x12f   : > { %v960_v28 = vpop.f32.mrf.mxu1  ;;  %v2825_v37 = vadd.f32 %v986_v23, %v903_v22  ;;  %v2829_v32 = vadd.f32 %v946_v25, %v904_v29 }
 0x130   : > { %v1691_v33 = vadd.f32 %v1690_v26, %v2821_v2  ;;  %v2831_v34 = vadd.f32 %v960_v28, %v905_v30 }
 0x132   : > { %v1692_v36 = vadd.f32 %v1691_v33, %v2825_v37  ;;  %v1695_v42 = vadd.f32 %v2831_v34, %v2829_v32 }
 0x134   : > { %1693 = vadd.xlane.f32.xlu1 %v1692_v36 }
 0x135   : > { %v974_v40 = vpop.f32.mrf.mxu2 }
 0x136   : > { %v2837_v43 = vadd.f32 %v974_v40, %v906_v39  ;;  %v988_v44 = vpop.f32.mrf.mxu3  ;;  %v1035_v45 = vpop.f32.mrf.mxu0 }
 0x137   : > { %v1049_v35 = vpop.f32.mrf.mxu1  ;;  %v2839_v46 = vadd.f32 %v988_v44, %v907_v41 }
 0x138   : > { %v1696_v47 = vadd.f32 %v1695_v42, %v2837_v43 }
 0x13a   : > { %v1697_v48 = vadd.f32 %v1696_v47, %v2839_v46 }
 0x13c   : > { %1698 = vadd.xlane.f32.xlu1 %v1697_v48 }
 0x13d   : > { %v1063_v38 = vpop.f32.mrf.mxu2 }
 0x13e   : > { %v1077_v51 = vpop.f32.mrf.mxu3  ;;  %v1037_v52 = vpop.f32.mrf.mxu0 }
 0x13f   : > { %v1051_v49 = vpop.f32.mrf.mxu1 }
 0x145   : > { %v1065_v54 = vpop.f32.mrf.mxu2 }
 0x146   : > { %v1079_v55 = vpop.f32.mrf.mxu3  ;;  %v1112_v56 = vpop.f32.mrf.mxu0 }
 0x147   : > { %v1126_v57 = vpop.f32.mrf.mxu1  ;;  %v1113_v13 = vadd.f32 %v1112_v56, %v1035_v45 }
 0x148   : > { %v1127_v14 = vadd.f32 %v1126_v57, %v1049_v35 }
 0x14d   : > { %v1140_v58 = vpop.f32.mrf.mxu2 }
 0x14e   : > { %v1154_v59 = vpop.f32.mrf.mxu3  ;;  %v1114_v1 = vpop.f32.mrf.mxu0  ;;  %v1141_v22 = vadd.f32 %v1140_v58, %v1063_v38 }
 0x14f   : > { %v1128_v3 = vpop.f32.mrf.mxu1  ;;  %v1155_v26 = vadd.f32 %v1154_v59, %v1077_v51  ;;  %v1115_v29 = vadd.f32 %v1114_v1, %v1037_v52 }
 0x150   : > { %v1129_v33 = vadd.f32 %v1128_v3, %v1051_v49 }
 0x155   : > { %v1142_v4 = vpop.f32.mrf.mxu2 }
 0x156   : > { %v1156_v5 = vpop.f32.mrf.mxu3  ;;  %v1195_v6 = vpop.f32.mrf.mxu0  ;;  %v1143_v47 = vadd.f32 %v1142_v4, %v1065_v54 }
 0x157   : > { %v1209_v60 = vpop.f32.mrf.mxu1  ;;  %v1242_v21 = vadd.f32 %v1195_v6, %v1113_v13  ;;  %v1157_v52 = vadd.f32 %v1156_v5, %v1079_v55 }
 0x158   : > { %v1243_v18 = vadd.f32 %v1209_v60, %v1127_v14 }
 0x15d   : > { %v1223_v8 = vpop.f32.mrf.mxu2 }
 0x15e   : > { %v1237_v61 = vpop.f32.mrf.mxu3  ;;  %v1197_v10 = vpop.f32.mrf.mxu0  ;;  %v1244_v28 = vadd.f32 %v1223_v8, %v1141_v22 }
 0x15f   : > { %v1211_v11 = vpop.f32.mrf.mxu1  ;;  %v1245_v31 = vadd.f32 %v1237_v61, %v1155_v26  ;;  %v1246_v42 = vadd.f32 %v1197_v10, %v1115_v29 }
 0x160   : > { %v1247_v44 = vadd.f32 %v1211_v11, %v1129_v33 }
 0x165   : > { %v1225_v12 = vpop.f32.mrf.mxu2 }
 0x166   : > { %v1239_v17 = vpop.f32.mrf.mxu3  ;;  %v1286_v20 = vpop.f32.mrf.mxu0  ;;  %v1248_v49 = vadd.f32 %v1225_v12, %v1143_v47 }
 0x167   : > { %v1300_v0 = vpop.f32.mrf.mxu1  ;;  %v2843_v23 = vadd.f32 %v1286_v20, %v1242_v21  ;;  %v1249_v57 = vadd.f32 %v1239_v17, %v1157_v52 }
 0x168   : > { %v2845_v25 = vadd.f32 %v1300_v0, %v1243_v18 }
 0x16a   : > { %v1702_v40 = vadd.f32 %v2845_v25, %v2843_v23 }
 0x16d   : > { %v1314_v30 = vpop.f32.mrf.mxu2 }
 0x16e   : > { %v2847_v36 = vadd.f32 %v1314_v30, %v1244_v28  ;;  %v1328_v27 = vpop.f32.mrf.mxu3  ;;  %v1288_v39 = vpop.f32.mrf.mxu0 }
 0x16f   : > { %v1302_v41 = vpop.f32.mrf.mxu1  ;;  %v2851_v45 = vadd.f32 %v1328_v27, %v1245_v31  ;;  %v2854_v48 = vadd.f32 %v1288_v39, %v1246_v42 }
 0x170   : > { %v1703_v35 = vadd.f32 %v1702_v40, %v2847_v36  ;;  %v2856_v38 = vadd.f32 %v1302_v41, %v1247_v44 }
 0x172   : > { %v1704_v51 = vadd.f32 %v1703_v35, %v2851_v45  ;;  %v1707_v58 = vadd.f32 %v2856_v38, %v2854_v48 }
 0x174   : > { %1705 = vadd.xlane.f32.xlu2 %v1704_v51 }
 0x175   : > { %v1316_v56 = vpop.f32.mrf.mxu2 }
 0x176   : > { %v2861_v59 = vadd.f32 %v1316_v56, %v1248_v49  ;;  %v1330_v1 = vpop.f32.mrf.mxu3  ;;  %v1377_v3 = vpop.f32.mrf.mxu0 }
 0x177   : > { %v1391_v6 = vpop.f32.mrf.mxu1  ;;  %v2863_v54 = vadd.f32 %v1330_v1, %v1249_v57 }
 0x178   : > { %v1708_v4 = vadd.f32 %v1707_v58, %v2861_v59 }
 0x17a   : > { %v1709_v60 = vadd.f32 %v1708_v4, %v2863_v54 }
 0x17c   : > { %1710 = vadd.xlane.f32.xlu2 %v1709_v60 }
 0x17d   : > { %v1405_v55 = vpop.f32.mrf.mxu2 }
 0x17e   : > { %v1419_v5 = vpop.f32.mrf.mxu3  ;;  %v1379_v8 = vpop.f32.mrf.mxu0 }
 0x17f   : > { %v1393_v61 = vpop.f32.mrf.mxu1 }
 0x185   : > { %v1407_v10 = vpop.f32.mrf.mxu2 }
 0x186   : > { %v1421_v11 = vpop.f32.mrf.mxu3  ;;  %v1454_v12 = vpop.f32.mrf.mxu0 }
 0x187   : > { %v1468_v13 = vpop.f32.mrf.mxu1  ;;  %v1455_v27 = vadd.f32 %v1454_v12, %v1377_v3 }
 0x188   : > { %v1469_v39 = vadd.f32 %v1468_v13, %v1391_v6 }
 0x18d   : > { %v1482_v14 = vpop.f32.mrf.mxu2 }
 0x18e   : > { %v1496_v17 = vpop.f32.mrf.mxu3  ;;  %v1456_v20 = vpop.f32.mrf.mxu0  ;;  %v1483_v47 = vadd.f32 %v1482_v14, %v1405_v55 }
 0x18f   : > { %v1470_v0 = vpop.f32.mrf.mxu1  ;;  %v1497_v49 = vadd.f32 %v1496_v17, %v1419_v5  ;;  %v1457_v57 = vadd.f32 %v1456_v20, %v1379_v8 }
 0x190   : > { %v1471_v1 = vadd.f32 %v1470_v0, %v1393_v61 }
 0x195   : > { %v1484_v21 = vpop.f32.mrf.mxu2 }
 0x196   : > { %v1498_v18 = vpop.f32.mrf.mxu3  ;;  %v1534_v22 = vpop.f32.mrf.mxu0  ;;  %v1485_v5 = vadd.f32 %v1484_v21, %v1407_v10 }
 0x197   : > { %v1548_v26 = vpop.f32.mrf.mxu1  ;;  %v1581_v44 = vadd.f32 %v1534_v22, %v1455_v27  ;;  %v1499_v20 = vadd.f32 %v1498_v18, %v1421_v11 }
 0x198   : > { %v1582_v35 = vadd.f32 %v1548_v26, %v1469_v39 }
 0x19d   : > { %v1562_v28 = vpop.f32.mrf.mxu2 }
 0x19e   : > { %v1576_v29 = vpop.f32.mrf.mxu3  ;;  %v1536_v30 = vpop.f32.mrf.mxu0  ;;  %v1583_v56 = vadd.f32 %v1562_v28, %v1483_v47 }
 0x19f   : > { %v1550_v33 = vpop.f32.mrf.mxu1  ;;  %v1584_v4 = vadd.f32 %v1576_v29, %v1497_v49  ;;  %v1585_v22 = vadd.f32 %v1536_v30, %v1457_v57 }
 0x1a0   : > { %v1586_v55 = vadd.f32 %v1550_v33, %v1471_v1 }
 0x1a5   : > { %v1564_v31 = vpop.f32.mrf.mxu2 }
 0x1a6   : > { %v1578_v40 = vpop.f32.mrf.mxu3  ;;  %v1625_v41 = vpop.f32.mrf.mxu0  ;;  %v1587_v0 = vadd.f32 %v1564_v31, %v1485_v5 }
 0x1a7   : > { %v1639_v42 = vpop.f32.mrf.mxu1  ;;  %v2867_v51 = vadd.f32 %v1625_v41, %v1581_v44  ;;  %v1588_v29 = vadd.f32 %v1578_v40, %v1499_v20  ;;  %v1684_v41 = vpop.xlane.xlu0 %1683 }
 0x1a8   : > { %v2869_v52 = vadd.f32 %v1639_v42, %v1582_v35  ;;  %v1694_v42 = vpop.xlane.xlu1 %1693 }
 0x1a9   : > { %v1700_v31 = vadd.f32 %v1694_v42, %v1684_v41 }
 0x1aa   : > { %v1714_v3 = vadd.f32 %v2869_v52, %v2867_v51 }
 0x1ad   : > { %v1653_v58 = vpop.f32.mrf.mxu2 }
 0x1ae   : > { %v2873_v6 = vadd.f32 %v1653_v58, %v1583_v56  ;;  %v1667_v60 = vpop.f32.mrf.mxu3  ;;  %v1627_v12 = vpop.f32.mrf.mxu0 }
 0x1af   : > { %v1641_v13 = vpop.f32.mrf.mxu1  ;;  %v2875_v14 = vadd.f32 %v1667_v60, %v1584_v4  ;;  %v2878_v17 = vadd.f32 %v1627_v12, %v1585_v22  ;;  %v1689_v11 = vpop.xlane.xlu0 %1688 }
 0x1b0   : > { %v1715_v26 = vadd.f32 %v1714_v3, %v2873_v6  ;;  %v2880_v8 = vadd.f32 %v1641_v13, %v1586_v55  ;;  %v1699_v40 = vpop.xlane.xlu1 %1698 }
 0x1b1   : > { %v1701_v56 = vadd.f32 %v1699_v40, %v1689_v11 }
 0x1b2   : > { %v1716_v61 = vadd.f32 %v1715_v26, %v2875_v14  ;;  %v1719_v30 = vadd.f32 %v2880_v8, %v2878_v17 }
 0x1b4   : > { %1717 = vadd.xlane.f32.xlu0 %v1716_v61 }
 0x1b5   : > { %v1655_v28 = vpop.f32.mrf.mxu2 }
 0x1b6   : > { %v2885_v33 = vadd.f32 %v1655_v28, %v1587_v0  ;;  %v1669_v27 = vpop.f32.mrf.mxu3 }
 0x1b7   : > { %v2887_v39 = vadd.f32 %v1669_v27, %v1588_v29 }
 0x1b8   : > { %v1720_v10 = vadd.f32 %v1719_v30, %v2885_v33 }
 0x1ba   : > { %v1721_v21 = vadd.f32 %v1720_v10, %v2887_v39 }
 0x1bc   : > { %1722 = vadd.xlane.f32.xlu1 %v1721_v21 }
 0x1e7   : > { %v1706_v18 = vpop.xlane.xlu2 %1705 }
 0x1e8   : > { %v1712_v44 = vadd.f32 %v1706_v18, %v1700_v31 }
 0x1ef   : > { %v1711_v57 = vpop.xlane.xlu2 %1710 }
 0x1f0   : > { %v1713_v22 = vadd.f32 %v1711_v57, %v1701_v56 }
 0x227   : > { %v1718_v35 = vpop.xlane.xlu0 %1717 }
 0x228   : > { %v1724_v47 = vadd.f32 %v1718_v35, %v1712_v44 }
 0x22a   : > { %v2891_v49 = vmul.f32 0.00048828125, %v1724_v47 }
 0x22c   : > { %v1782_v58 = vsub.f32 %v2843_v23, %v2891_v49  ;;  %v1783_v1 = vsub.f32 %v2845_v25, %v2891_v49  ;;  %v1784_v4 = vsub.f32 %v2847_v36, %v2891_v49  ;;  %v1785_v3 = vsub.f32 %v2851_v45, %v2891_v49 }
 0x22d   : > { %v1754_v60 = vsub.f32 %v2815_v15, %v2891_v49  ;;  %v1755_v12 = vsub.f32 %v2817_v16, %v2891_v49  ;;  %v1756_v13 = vsub.f32 %v2821_v2, %v2891_v49  ;;  %v1757_v5 = vsub.f32 %v2825_v37, %v2891_v49 }
 0x22e   : > { %v1790_v55 = vmul.f32 %v1782_v58, %v1782_v58  ;;  %v1791_v26 = vmul.f32 %v1783_v1, %v1783_v1  ;;  %v1792_v20 = vmul.f32 %v1784_v4, %v1784_v4  ;;  %v1793_v0 = vmul.f32 %v1785_v3, %v1785_v3 }
 0x22f   : > { %v1723_v61 = vpop.xlane.xlu1 %1722  ;;  %v1762_v28 = vmul.f32 %v1754_v60, %v1754_v60  ;;  %v1763_v29 = vmul.f32 %v1755_v12, %v1755_v12  ;;  %v1728_v10 = vsub.f32 %v2743_v50, %v2891_v49  ;;  %v1729_v21 = vsub.f32 %v2745_v53, %v2891_v49 }
 0x230   : > { %v1725_v30 = vadd.f32 %v1723_v61, %v1713_v22  ;;  %v1798_v27 = vadd.f32 %v1791_v26, %v1790_v55  ;;  %v1764_v41 = vmul.f32 %v1756_v13, %v1756_v13  ;;  %v1730_v11 = vsub.f32 %v2752_v62, %v2891_v49 }
 0x231   : > { %v1770_v42 = vadd.f32 %v1763_v29, %v1762_v28  ;;  %v1731_v18 = vsub.f32 %v2756_v7, %v2891_v49  ;;  %v1736_v40 = vmul.f32 %v1728_v10, %v1728_v10  ;;  %v1737_v35 = vmul.f32 %v1729_v21, %v1729_v21 }
 0x232   : > { %v2917_v31 = vmul.f32 0.00048828125, %v1725_v30  ;;  %v1799_v44 = vadd.f32 %v1798_v27, %v1792_v20  ;;  %v1765_v47 = vmul.f32 %v1757_v5, %v1757_v5  ;;  %v1738_v57 = vmul.f32 %v1730_v11, %v1730_v11 }
 0x233   : > { %v1771_v56 = vadd.f32 %v1770_v42, %v1764_v41  ;;  %v1739_v58 = vmul.f32 %v1731_v18, %v1731_v18  ;;  %v1744_v4 = vadd.f32 %v1737_v35, %v1736_v40  ;;  %v1810_v30 = vsub.f32 %v2867_v51, %v2891_v49 }
 0x234   : > { %v1800_v1 = vadd.f32 %v1799_v44, %v1793_v0  ;;  %v1732_v3 = vsub.f32 %v2761_v63, %v2917_v31  ;;  %v1733_v60 = vsub.f32 %v2763_v9, %v2917_v31  ;;  %v1734_v13 = vsub.f32 %v2769_v19, %v2917_v31 }
 0x235   : > { %v1772_v12 = vadd.f32 %v1771_v56, %v1765_v47  ;;  %v1735_v22 = vsub.f32 %v2778_v24, %v2917_v31  ;;  %v1786_v55 = vsub.f32 %v2854_v48, %v2917_v31  ;;  %v1745_v26 = vadd.f32 %v1744_v4, %v1738_v57 }
 0x236   : > { %1801 = vadd.xlane.f32.xlu0 %v1800_v1  ;;  %v1740_v5 = vmul.f32 %v1732_v3, %v1732_v3  ;;  %v1741_v61 = vmul.f32 %v1733_v60, %v1733_v60  ;;  %v1787_v20 = vsub.f32 %v2856_v38, %v2917_v31  ;;  %v1742_v0 = vmul.f32 %v1734_v13, %v1734_v13 }
 0x237   : > { %1773 = vadd.xlane.f32.xlu1 %v1772_v12  ;;  %v1788_v28 = vsub.f32 %v2861_v59, %v2917_v31  ;;  %v1789_v29 = vsub.f32 %v2863_v54, %v2917_v31  ;;  %v1746_v27 = vadd.f32 %v1745_v26, %v1739_v58  ;;  %v1794_v21 = vmul.f32 %v1786_v55, %v1786_v55 }
 0x238   : > { %v1749_v10 = vadd.f32 %v1741_v61, %v1740_v5  ;;  %v1795_v41 = vmul.f32 %v1787_v20, %v1787_v20  ;;  %v1743_v42 = vmul.f32 %v1735_v22, %v1735_v22  ;;  %v1758_v18 = vsub.f32 %v2829_v32, %v2917_v31 }
 0x239   : > { %v1796_v11 = vmul.f32 %v1788_v28, %v1788_v28  ;;  %v1759_v44 = vsub.f32 %v2831_v34, %v2917_v31  ;;  %1747 = vadd.xlane.f32.xlu2 %v1746_v27  ;;  %v1760_v47 = vsub.f32 %v2837_v43, %v2917_v31  ;;  %v1761_v56 = vsub.f32 %v2839_v46, %v2917_v31 }
 0x23a   : > { %v1750_v40 = vadd.f32 %v1749_v10, %v1742_v0  ;;  %v1803_v35 = vadd.f32 %v1795_v41, %v1794_v21  ;;  %v1766_v57 = vmul.f32 %v1758_v18, %v1758_v18  ;;  %v1814_v1 = vsub.f32 %v2878_v17, %v2917_v31 }
 0x23b   : > { %v1767_v58 = vmul.f32 %v1759_v44, %v1759_v44  ;;  %v1815_v4 = vsub.f32 %v2880_v8, %v2917_v31  ;;  %v1797_v60 = vmul.f32 %v1789_v29, %v1789_v29  ;;  %v1811_v13 = vsub.f32 %v2869_v52, %v2891_v49 }
 0x23c   : > { %v1751_v3 = vadd.f32 %v1750_v40, %v1743_v42  ;;  %v1804_v12 = vadd.f32 %v1803_v35, %v1796_v11  ;;  %v1768_v22 = vmul.f32 %v1760_v47, %v1760_v47  ;;  %v1816_v26 = vsub.f32 %v2885_v33, %v2917_v31 }
 0x23d   : > { %v1775_v55 = vadd.f32 %v1767_v58, %v1766_v57  ;;  %v1822_v5 = vmul.f32 %v1814_v1, %v1814_v1  ;;  %v1817_v20 = vsub.f32 %v2887_v39, %v2917_v31  ;;  %v1823_v0 = vmul.f32 %v1815_v4, %v1815_v4 }
 0x23e   : > { %1752 = vadd.xlane.f32.xlu0 %v1751_v3  ;;  %v1805_v61 = vadd.f32 %v1804_v12, %v1797_v60  ;;  %v1769_v28 = vmul.f32 %v1761_v56, %v1761_v56  ;;  %v1812_v29 = vsub.f32 %v2873_v6, %v2891_v49  ;;  %v1818_v10 = vmul.f32 %v1810_v30, %v1810_v30 }
 0x23f   : > { %v1776_v27 = vadd.f32 %v1775_v55, %v1768_v22  ;;  %v1824_v21 = vmul.f32 %v1816_v26, %v1816_v26  ;;  %v1831_v41 = vadd.f32 %v1823_v0, %v1822_v5  ;;  %v1819_v42 = vmul.f32 %v1811_v13, %v1811_v13 }
 0x240   : > { %1806 = vadd.xlane.f32.xlu1 %v1805_v61  ;;  %v1825_v18 = vmul.f32 %v1817_v20, %v1817_v20  ;;  %v1813_v35 = vsub.f32 %v2875_v14, %v2891_v49  ;;  %v1820_v47 = vmul.f32 %v1812_v29, %v1812_v29 }
 0x241   : > { %v1777_v11 = vadd.f32 %v1776_v27, %v1769_v28  ;;  %v1832_v44 = vadd.f32 %v1831_v41, %v1824_v21  ;;  %v1826_v40 = vadd.f32 %v1819_v42, %v1818_v10 }
 0x242   : > { %v1821_v58 = vmul.f32 %v1813_v35, %v1813_v35 }
 0x243   : > { %1778 = vadd.xlane.f32.xlu2 %v1777_v11  ;;  %v1833_v57 = vadd.f32 %v1832_v44, %v1825_v18  ;;  %v1827_v56 = vadd.f32 %v1826_v40, %v1820_v47 }
 0x245   : > { %v1828_v1 = vadd.f32 %v1827_v56, %v1821_v58  ;;  %v1863_v58 = vsub.f32 0.0, %v2917_v31 }
 0x246   : > { %1834 = vadd.xlane.f32.xlu0 %v1833_v57 }
 0x24b   : > { %1829 = vadd.xlane.f32.xlu2 %v1828_v1 }
 0x2a9   : > { %v1802_v30 = vpop.xlane.xlu0 %1801 }
 0x2aa   : > { %v1774_v3 = vpop.xlane.xlu1 %1773 }
 0x2ac   : > { %v1748_v4 = vpop.xlane.xlu2 %1747 }
 0x2ad   : > { %v1780_v55 = vadd.f32 %v1774_v3, %v1748_v4 }
 0x2af   : > { %v1808_v0 = vadd.f32 %v1802_v30, %v1780_v55 }
 0x2b1   : > { %v1753_v60 = vpop.xlane.xlu0 %1752 }
 0x2b3   : > { %v1807_v22 = vpop.xlane.xlu1 %1806 }
 0x2b6   : > { %v1779_v12 = vpop.xlane.xlu2 %1778 }
 0x2b7   : > { %v1781_v13 = vadd.f32 %v1779_v12, %v1753_v60 }
 0x2b9   : > { %v1835_v26 = vpop.xlane.xlu0 %1834  ;;  %v1809_v5 = vadd.f32 %v1807_v22, %v1781_v13 }
 0x2bb   : > { %v1837_v61 = vadd.f32 %v1835_v26, %v1809_v5 }
 0x2bd   : > { %v1839_v20 = vmul.f32 0.00048828125, %v1837_v61 }
 0x2be   : > { %v1830_v28 = vpop.xlane.xlu2 %1829 }
 0x2bf   : > { %v1841_v27 = vadd.f32 1e-05, %v1839_v20  ;;  %v1836_v29 = vadd.f32 %v1830_v28, %v1808_v0 }
 0x2c1   : > { %2456 = vrsqrt.f32 %v1841_v27  ;;  %v1838_v10 = vmul.f32 0.00048828125, %v1836_v29  ;;  %vm1858_vm3 = vweird.f32 %v1841_v27 }
 0x2c3   : > { %v2959_v21 = vadd.f32 1e-05, %v1838_v10 }
 0x2c5   : > { %2458 = vrsqrt.f32 %v2959_v21  ;;  %vm1848_vm14 = vweird.f32 %v2959_v21 }
 0x2c7   : > { %v2457_v41 = vpop.eup %2456 }
 0x2c8   : > { %v1853_v42 = vmul.f32 %v2457_v41, %v1841_v27  ;;  %vm1859_vm2 = vweird.f32 %v2457_v41 }
 0x2c9   : > { %vm1860_vm4 = vmor %vm1858_vm3, %vm1859_vm2 }
 0x2ca   : > { %v1854_v11 = vmul.f32 %v2457_v41, %v1853_v42 }
 0x2cb   : > { %v2962_v18 = vpop.eup %2458 }
 0x2cc   : > { %v1855_v44 = vmul.f32 0.5, %v1854_v11  ;;  %v1843_v40 = vmul.f32 %v2962_v18, %v2959_v21  ;;  %vm1849_vm11 = vweird.f32 %v2962_v18 }
 0x2ce   : > { %v1856_v35 = vsub.f32 1.5, %v1855_v44  ;;  %v1844_v47 = vmul.f32 %v2962_v18, %v1843_v40 }
 0x2d0   : > { %v1857_v57 = vmul.f32 %v2457_v41, %v1856_v35  ;;  %v2967_v56 = vmul.f32 0.5, %v1844_v47 }
 0x2d2   : > { %v2970_v1 = vsel %vm1860_vm4, %v2457_v41, %v1857_v57  ;;  %v1846_v30 = vsub.f32 1.5, %v2967_v56  ;;  %vm1850_vm4 = vmor %vm1848_vm14, %vm1849_vm11  ;;  %v1862_v56 = vsub.f32 0.0, %v2891_v49 }
 0x2d3   : > { %v2974_v4 = vmul.f32 %v1863_v58, %v2970_v1  ;;  %v1870_v3 = vmul.f32 %v2970_v1, %v2761_v63  ;;  %v1871_v60 = vmul.f32 %v2970_v1, %v2763_v9  ;;  %v1872_v12 = vmul.f32 %v2970_v1, %v2769_v19 }
 0x2d4   : > { %v1873_v31 = vmul.f32 %v2970_v1, %v2778_v24  ;;  %v1918_v13 = vmul.f32 %v2970_v1, %v2829_v32  ;;  %v1919_v22 = vmul.f32 %v2970_v1, %v2831_v34  ;;  %v1920_v63 = vmul.f32 %v2970_v1, %v2837_v43 }
 0x2d5   : > { %v1878_v55 = vadd.f32 %v1870_v3, %v2974_v4  ;;  %v1879_v9 = vadd.f32 %v1871_v60, %v2974_v4  ;;  %v1880_v19 = vadd.f32 %v1872_v12, %v2974_v4  ;;  %v1921_v26 = vmul.f32 %v2970_v1, %v2839_v46 }
 0x2d6   : > { %v1881_v24 = vadd.f32 %v1873_v31, %v2974_v4  ;;  %v1926_v5 = vadd.f32 %v1918_v13, %v2974_v4  ;;  %v1927_v32 = vadd.f32 %v1919_v22, %v2974_v4  ;;  %v1928_v34 = vadd.f32 %v1920_v63, %v2974_v4 }
 0x2d7   : > { %vm1886_vm5 = vcmp.ge.f32.partialorder %v1878_v55, 0.0  ;;  %vm1887_vm6 = vcmp.ge.f32.partialorder %v1879_v9, 0.0  ;;  %vm1888_vm7 = vcmp.ge.f32.partialorder %v1880_v19, 0.0  ;;  %v1894_v43 = vmul.f32 0.1, %v1878_v55 }
 0x2d8   : > { %vm1889_vm8 = vcmp.ge.f32.partialorder %v1881_v24, 0.0  ;;  %v1895_v61 = vmul.f32 0.1, %v1879_v9  ;;  %v1896_v20 = vmul.f32 0.1, %v1880_v19  ;;  %v1929_v0 = vadd.f32 %v1921_v26, %v2974_v4 }
 0x2d9   : > { %v1897_v28 = vmul.f32 0.1, %v1881_v24  ;;  %v1902_v27 = vsel %vm1886_vm5, %v1878_v55, %v1894_v43  ;;  %vm1934_vm9 = vcmp.ge.f32.partialorder %v1926_v5, 0.0  ;;  %vm1935_vm10 = vcmp.ge.f32.partialorder %v1927_v32, 0.0 }
 0x2da   : > { %v1903_v46 = vsel %vm1887_vm6, %v1879_v9, %v1895_v61  ;;  %v1904_v29 = vsel %vm1888_vm7, %v1880_v19, %v1896_v20  ;;  %1910 = vst [vmem:[%s3003_s9 + $0x20] sm:$0xff] %v1902_v27  ;;  %vm1936_vm12 = vcmp.ge.f32.partialorder %v1928_v34, 0.0  ;;  %vm1937_vm13 = vcmp.ge.f32.partialorder %v1929_v0, 0.0 }
 0x2db   : > { %v1905_v10 = vsel %vm1889_vm8, %v1881_v24, %v1897_v28  ;;  %1911 = vst [vmem:[%s3003_s9 + $0x28] sm:$0xff] %v1903_v46  ;;  %v1942_v41 = vmul.f32 0.1, %v1926_v5  ;;  %v1943_v42 = vmul.f32 0.1, %v1927_v32  ;;  %v1967_v11 = vmul.f32 %v2970_v1, %v2854_v48 }
 0x2dc   : > { %1912 = vst [vmem:[%s3003_s9 + $0x30] sm:$0xff] %v1904_v29  ;;  %v1944_v44 = vmul.f32 0.1, %v1928_v34  ;;  %v1945_v40 = vmul.f32 0.1, %v1929_v0  ;;  %v1968_v35 = vmul.f32 %v2970_v1, %v2856_v38  ;;  %v1969_v47 = vmul.f32 %v2970_v1, %v2861_v59 }
 0x2dd   : > { %1913 = vst [vmem:[%s3003_s9 + $0x38] sm:$0xff] %v1905_v10  ;;  %v1950_v57 = vsel %vm1934_vm9, %v1926_v5, %v1942_v41  ;;  %v1951_v58 = vsel %vm1935_vm10, %v1927_v32, %v1943_v42  ;;  %v1970_v48 = vmul.f32 %v2970_v1, %v2863_v54  ;;  %v1975_v3 = vadd.f32 %v1967_v11, %v2974_v4 }
 0x2de   : > { %v1952_v60 = vsel %vm1936_vm12, %v1928_v34, %v1944_v44  ;;  %v1953_v12 = vsel %vm1937_vm13, %v1929_v0, %v1945_v40  ;;  %2387 = vst [vmem:[%s3003_s9 + $0x60] sm:$0xff] %v1950_v57  ;;  %v1976_v38 = vadd.f32 %v1968_v35, %v2974_v4  ;;  %v1977_v59 = vadd.f32 %v1969_v47, %v2974_v4 }
 0x2df   : > { %2388 = vst [vmem:[%s3003_s9 + $0x68] sm:$0xff] %v1951_v58  ;;  %v1978_v31 = vadd.f32 %v1970_v48, %v2974_v4  ;;  %vm1983_vm15 = vcmp.ge.f32.partialorder %v1975_v3, 0.0  ;;  %v1991_v13 = vmul.f32 0.1, %v1975_v3  ;;  %v2016_v54 = vmul.f32 %v2970_v1, %v2878_v17 }
 0x2e0   : > { %2389 = vst [vmem:[%s3003_s9 + $0x70] sm:$0xff] %v1952_v60  ;;  %vm1984_vm0 = vcmp.ge.f32.partialorder %v1976_v38, 0.0  ;;  %vm1985_vm1 = vcmp.ge.f32.partialorder %v1977_v59, 0.0  ;;  %v1992_v22 = vmul.f32 0.1, %v1976_v38  ;;  %v2017_v63 = vmul.f32 %v2970_v1, %v2880_v8 }
 0x2e1   : > { %2390 = vst [vmem:[%s3003_s9 + $0x78] sm:$0xff] %v1953_v12  ;;  %vm1986_vm2 = vcmp.ge.f32.partialorder %v1978_v31, 0.0  ;;  %v1993_v55 = vmul.f32 0.1, %v1977_v59  ;;  %v1994_v9 = vmul.f32 0.1, %v1978_v31  ;;  %v1999_v19 = vsel %vm1983_vm15, %v1975_v3, %v1991_v13 }
 0x2e2   : > { %v2000_v26 = vsel %vm1984_vm0, %v1976_v38, %v1992_v22  ;;  %2395 = vst [vmem:[%s3003_s9 + $0xa0] sm:$0xff] %v1999_v19  ;;  %v2018_v17 = vmul.f32 %v2970_v1, %v2885_v33  ;;  %v2019_v24 = vmul.f32 %v2970_v1, %v2887_v39  ;;  %v2024_v5 = vadd.f32 %v2016_v54, %v2974_v4 }
 0x2e3   : > { %v2001_v32 = vsel %vm1985_vm1, %v1977_v59, %v1993_v55  ;;  %v2002_v34 = vsel %vm1986_vm2, %v1978_v31, %v1994_v9  ;;  %2396 = vst [vmem:[%s3003_s9 + $0xa8] sm:$0xff] %v2000_v26  ;;  %v2025_v8 = vadd.f32 %v2017_v63, %v2974_v4  ;;  %v1847_v43 = vmul.f32 %v2962_v18, %v1846_v30 }
 0x2e4   : > { %2397 = vst [vmem:[%s3003_s9 + $0xb0] sm:$0xff] %v2001_v32  ;;  %v2026_v61 = vadd.f32 %v2018_v17, %v2974_v4  ;;  %v2027_v20 = vadd.f32 %v2019_v24, %v2974_v4  ;;  %vm2032_vm3 = vcmp.ge.f32.partialorder %v2024_v5, 0.0  ;;  %v2040_v33 = vmul.f32 0.1, %v2024_v5 }
 0x2e5   : > { %2398 = vst [vmem:[%s3003_s9 + $0xb8] sm:$0xff] %v2002_v34  ;;  %vm2033_vm5 = vcmp.ge.f32.partialorder %v2025_v8, 0.0  ;;  %v2041_v39 = vmul.f32 0.1, %v2025_v8  ;;  %v3055_v1 = vsel %vm1850_vm4, %v2962_v18, %v1847_v43 }
 0x2e6   : > { %vm2034_vm6 = vcmp.ge.f32.partialorder %v2026_v61, 0.0  ;;  %vm2035_vm7 = vcmp.ge.f32.partialorder %v2027_v20, 0.0  ;;  %v2042_v30 = vmul.f32 0.1, %v2026_v61  ;;  %v2043_v4 = vmul.f32 0.1, %v2027_v20 }
 0x2e7   : > { %v2048_v0 = vsel %vm2032_vm3, %v2024_v5, %v2040_v33  ;;  %v2049_v28 = vsel %vm2033_vm5, %v2025_v8, %v2041_v39  ;;  %v3058_v21 = vmul.f32 %v1862_v56, %v3055_v1  ;;  %v1866_v27 = vmul.f32 %v3055_v1, %v2743_v50 }
 0x2e8   : > { %v2050_v46 = vsel %vm2034_vm6, %v2026_v61, %v2042_v30  ;;  %v2051_v29 = vsel %vm2035_vm7, %v2027_v20, %v2043_v4  ;;  %2403 = vst [vmem:[%s3003_s9 + $0xe0] sm:$0xff] %v2048_v0  ;;  %v1867_v49 = vmul.f32 %v3055_v1, %v2745_v53  ;;  %v1868_v18 = vmul.f32 %v3055_v1, %v2752_v62 }
 0x2e9   : > { %2404 = vst [vmem:[%s3003_s9 + $0xe8] sm:$0xff] %v2049_v28  ;;  %v1869_v10 = vmul.f32 %v3055_v1, %v2756_v7  ;;  %v1874_v41 = vadd.f32 %v1866_v27, %v3058_v21  ;;  %v1914_v42 = vmul.f32 %v3055_v1, %v2815_v15  ;;  %v1915_v50 = vmul.f32 %v3055_v1, %v2817_v16 }
 0x2ea   : > { %2405 = vst [vmem:[%s3003_s9 + $0xf0] sm:$0xff] %v2050_v46  ;;  %v1875_v11 = vadd.f32 %v1867_v49, %v3058_v21  ;;  %v1876_v53 = vadd.f32 %v1868_v18, %v3058_v21  ;;  %v1916_v62 = vmul.f32 %v3055_v1, %v2821_v2  ;;  %v1917_v44 = vmul.f32 %v3055_v1, %v2825_v37 }
 0x2eb   : > { %2406 = vst [vmem:[%s3003_s9 + $0xf8] sm:$0xff] %v2051_v29  ;;  %v1877_v7 = vadd.f32 %v1869_v10, %v3058_v21  ;;  %vm1882_vm8 = vcmp.ge.f32.partialorder %v1874_v41, 0.0  ;;  %v1890_v15 = vmul.f32 0.1, %v1874_v41  ;;  %v1922_v16 = vadd.f32 %v1914_v42, %v3058_v21  ;;  %v2094_v42 = vld [vmem:[%s3003_s9 + $0x28] sm:$0xff] (%p2529_p5) }
 0x2ec   : > { %vm1883_vm9 = vcmp.ge.f32.partialorder %v1875_v11, 0.0  ;;  %vm1884_vm10 = vcmp.ge.f32.partialorder %v1876_v53, 0.0  ;;  %v1891_v40 = vmul.f32 0.1, %v1875_v11  ;;  %v1892_v35 = vmul.f32 0.1, %v1876_v53 }
 0x2ed   : > { %vm1885_vm11 = vcmp.ge.f32.partialorder %v1877_v7, 0.0  ;;  %v1893_v47 = vmul.f32 0.1, %v1877_v7  ;;  %v1898_v2 = vsel %vm1882_vm8, %v1874_v41, %v1890_v15  ;;  %v1923_v57 = vadd.f32 %v1915_v50, %v3058_v21  ;;  %v2092_v41 = vld [vmem:[%s3003_s9 + $0x20] sm:$0xff] (%p2529_p5)  ;;  %v2096_v50 = vld [vmem:[%s3003_s9 + $0x30] sm:$0xff] (%p2529_p5)  ;;  %2095 = vst [vmem:[%s3137_s17 + $0x28] sm:$0xff] (%p2529_p5), %v2094_v42 }
 0x2ee   : > { %v1899_v37 = vsel %vm1883_vm9, %v1875_v11, %v1891_v40  ;;  %v1900_v58 = vsel %vm1884_vm10, %v1876_v53, %v1892_v35  ;;  %1906 = vst [vmem:[%s3003_s9] sm:$0xff] %v1898_v2  ;;  %v1924_v48 = vadd.f32 %v1916_v62, %v3058_v21  ;;  %v1925_v3 = vadd.f32 %v1917_v44, %v3058_v21  ;;  %v2098_v11 = vld [vmem:[%s3003_s9 + $0x38] sm:$0xff] (%p2529_p5)  ;;  %v2108_v15 = vld [vmem:[%s3003_s9 + $0x60] sm:$0xff] (%p2529_p5)  ;;  %v2112_v40 = vld [vmem:[%s3003_s9 + $0x70] sm:$0xff] (%p2529_p5) }
 0x2ef   : > { %v1901_v60 = vsel %vm1885_vm11, %v1877_v7, %v1893_v47  ;;  %1907 = vst [vmem:[%s3003_s9 + $0x8] sm:$0xff] %v1899_v37  ;;  %vm1930_vm12 = vcmp.ge.f32.partialorder %v1922_v16, 0.0  ;;  %vm1931_vm13 = vcmp.ge.f32.partialorder %v1923_v57, 0.0  ;;  %v1938_v12 = vmul.f32 0.1, %v1922_v16  ;;  %v2114_v35 = vld [vmem:[%s3003_s9 + $0x78] sm:$0xff] (%p2529_p5) }
 0x2f0   : > { %1908 = vst [vmem:[%s3003_s9 + $0x10] sm:$0xff] %v1900_v58  ;;  %vm1932_vm14 = vcmp.ge.f32.partialorder %v1924_v48, 0.0  ;;  %vm1933_vm15 = vcmp.ge.f32.partialorder %v1925_v3, 0.0  ;;  %v1939_v38 = vmul.f32 0.1, %v1923_v57  ;;  %v1963_v59 = vmul.f32 %v3055_v1, %v2843_v23  ;;  %v2124_v58 = vld [vmem:[%s3003_s9 + $0xa0] sm:$0xff] (%p2529_p5) }
 0x2f1   : > { %1909 = vst [vmem:[%s3003_s9 + $0x18] sm:$0xff] %v1901_v60  ;;  %v1940_v31 = vmul.f32 0.1, %v1924_v48  ;;  %v1941_v13 = vmul.f32 0.1, %v1925_v3  ;;  %v1946_v54 = vsel %vm1930_vm12, %v1922_v16, %v1938_v12  ;;  %v1964_v22 = vmul.f32 %v3055_v1, %v2845_v25  ;;  %v2110_v16 = vld [vmem:[%s3003_s9 + $0x68] sm:$0xff] (%p2529_p5) }
 0x2f2   : > { %v1947_v63 = vsel %vm1931_vm13, %v1923_v57, %v1939_v38  ;;  %2383 = vst [vmem:[%s3003_s9 + $0x40] sm:$0xff] %v1946_v54  ;;  %v1965_v55 = vmul.f32 %v3055_v1, %v2847_v36  ;;  %v1966_v9 = vmul.f32 %v3055_v1, %v2851_v45  ;;  %v1971_v19 = vadd.f32 %v1963_v59, %v3058_v21  ;;  %v2130_v60 = vld [vmem:[%s3003_s9 + $0xb8] sm:$0xff] (%p2529_p5)  ;;  %v2142_v54 = vld [vmem:[%s3003_s9 + $0xe8] sm:$0xff] (%p2529_p5) }
 0x2f3   : > { %v1948_v23 = vsel %vm1932_vm14, %v1924_v48, %v1940_v31  ;;  %v1949_v26 = vsel %vm1933_vm15, %v1925_v3, %v1941_v13  ;;  %2384 = vst [vmem:[%s3003_s9 + $0x48] sm:$0xff] %v1947_v63  ;;  %v1972_v17 = vadd.f32 %v1964_v22, %v3058_v21  ;;  %v2012_v24 = vmul.f32 %v3055_v1, %v2867_v51  ;;  %v2126_v48 = vld [vmem:[%s3003_s9 + $0xa8] sm:$0xff] (%p2529_p5)  ;;  %v2128_v3 = vld [vmem:[%s3003_s9 + $0xb0] sm:$0xff] (%p2529_p5)  ;;  %v2140_v13 = vld [vmem:[%s3003_s9 + $0xe0] sm:$0xff] (%p2529_p5) }
 0x2f4   : > { %2385 = vst [vmem:[%s3003_s9 + $0x50] sm:$0xff] %v1948_v23  ;;  %v1973_v25 = vadd.f32 %v1965_v55, %v3058_v21  ;;  %v1974_v5 = vadd.f32 %v1966_v9, %v3058_v21  ;;  %vm1979_vm0 = vcmp.ge.f32.partialorder %v1971_v19, 0.0  ;;  %v1987_v36 = vmul.f32 0.1, %v1971_v19  ;;  %v2144_v22 = vld [vmem:[%s3003_s9 + $0xf0] sm:$0xff] (%p2529_p5)  ;;  %v2146_v63 = vld [vmem:[%s3003_s9 + $0xf8] sm:$0xff] (%p2529_p5) }
 0x2f5   : > { %2386 = vst [vmem:[%s3003_s9 + $0x58] sm:$0xff] %v1949_v26  ;;  %vm1980_vm1 = vcmp.ge.f32.partialorder %v1972_v17, 0.0  ;;  %v1988_v45 = vmul.f32 0.1, %v1972_v17  ;;  %v2013_v32 = vmul.f32 %v3055_v1, %v2869_v52  ;;  %v2014_v34 = vmul.f32 %v3055_v1, %v2873_v6 }
 0x2f6   : > { %vm1981_vm2 = vcmp.ge.f32.partialorder %v1973_v25, 0.0  ;;  %vm1982_vm3 = vcmp.ge.f32.partialorder %v1974_v5, 0.0  ;;  %v1989_v51 = vmul.f32 0.1, %v1973_v25  ;;  %v1990_v8 = vmul.f32 0.1, %v1974_v5 }
 0x2f7   : > { %v1995_v43 = vsel %vm1979_vm0, %v1971_v19, %v1987_v36  ;;  %v1996_v61 = vsel %vm1980_vm1, %v1972_v17, %v1988_v45  ;;  %v2015_v20 = vmul.f32 %v3055_v1, %v2875_v14  ;;  %v2020_v33 = vadd.f32 %v2012_v24, %v3058_v21  ;;  %v2086_v49 = vld [vmem:[%s3003_s9 + $0x8] sm:$0xff] (%p2529_p5)  ;;  %v2088_v18 = vld [vmem:[%s3003_s9 + $0x10] sm:$0xff] (%p2529_p5)  ;;  %2093 = vst [vmem:[%s3137_s17 + $0x20] sm:$0xff] (%p2529_p5), %v2092_v41 }
 0x2f8   : > { %v1997_v39 = vsel %vm1981_vm2, %v1973_v25, %v1989_v51  ;;  %v1998_v56 = vsel %vm1982_vm3, %v1974_v5, %v1990_v8  ;;  %2391 = vst [vmem:[%s3003_s9 + $0x80] sm:$0xff] %v1995_v43  ;;  %v2021_v52 = vadd.f32 %v2013_v32, %v3058_v21  ;;  %v2022_v6 = vadd.f32 %v2014_v34, %v3058_v21  ;;  %v2090_v10 = vld [vmem:[%s3003_s9 + $0x18] sm:$0xff] (%p2529_p5) }
 0x2f9   : > { %2392 = vst [vmem:[%s3003_s9 + $0x88] sm:$0xff] %v1996_v61  ;;  %v2023_v30 = vadd.f32 %v2015_v20, %v3058_v21  ;;  %vm2028_vm4 = vcmp.ge.f32.partialorder %v2020_v33, 0.0  ;;  %v2036_v4 = vmul.f32 0.1, %v2020_v33  ;;  %v2084_v21 = vld [vmem:[%s3003_s9] sm:$0xff] (%p2529_p5) }
 0x2fa   : > { %2393 = vst [vmem:[%s3003_s9 + $0x90] sm:$0xff] %v1997_v39  ;;  %vm2029_vm5 = vcmp.ge.f32.partialorder %v2021_v52, 0.0  ;;  %vm2030_vm6 = vcmp.ge.f32.partialorder %v2022_v6, 0.0  ;;  %v2037_v14 = vmul.f32 0.1, %v2021_v52  ;;  %v2100_v53 = vld [vmem:[%s3003_s9 + $0x40] sm:$0xff] (%p2529_p5) }
 0x2fb   : > { %2394 = vst [vmem:[%s3003_s9 + $0x98] sm:$0xff] %v1998_v56  ;;  %vm2031_vm7 = vcmp.ge.f32.partialorder %v2023_v30, 0.0  ;;  %v2038_v1 = vmul.f32 0.1, %v2022_v6  ;;  %v2039_v0 = vmul.f32 0.1, %v2023_v30  ;;  %v2044_v28 = vsel %vm2028_vm4, %v2020_v33, %v2036_v4 }
 0x2fc   : > { %v2045_v27 = vsel %vm2029_vm5, %v2021_v52, %v2037_v14  ;;  %2399 = vst [vmem:[%s3003_s9 + $0xc0] sm:$0xff] %v2044_v28  ;;  %2067 = sbr.rel (!%p2529_p5) target bundleno = 798 (0x31e), region = 73  ;;  %v2102_v62 = vld [vmem:[%s3003_s9 + $0x48] sm:$0xff] (%p2529_p5)  ;;  %v2104_v44 = vld [vmem:[%s3003_s9 + $0x50] sm:$0xff] (%p2529_p5)  ;;  %v2106_v7 = vld [vmem:[%s3003_s9 + $0x58] sm:$0xff] (%p2529_p5) }
 0x2fd   : > { %v2046_v46 = vsel %vm2030_vm6, %v2022_v6, %v2038_v1  ;;  %v2047_v29 = vsel %vm2031_vm7, %v2023_v30, %v2039_v0  ;;  %2400 = vst [vmem:[%s3003_s9 + $0xc8] sm:$0xff] %v2045_v27 }
 0x2fe   : > { %2401 = vst [vmem:[%s3003_s9 + $0xd0] sm:$0xff] %v2046_v46 }
 0x2ff   : > { %2402 = vst [vmem:[%s3003_s9 + $0xd8] sm:$0xff] %v2047_v29  ;;  %v2116_v47 = vld [vmem:[%s3003_s9 + $0x80] sm:$0xff] (%p2529_p5) }
 0x300   : > { %2085 = vst [vmem:[%s3137_s17] sm:$0xff] (%p2529_p5), %v2084_v21  ;;  %v2118_v2 = vld [vmem:[%s3003_s9 + $0x88] sm:$0xff] (%p2529_p5) }
 0x301   : > { %2087 = vst [vmem:[%s3137_s17 + $0x8] sm:$0xff] %v2086_v49  ;;  %v2120_v57 = vld [vmem:[%s3003_s9 + $0x90] sm:$0xff] }
 0x302   : > { %2089 = vst [vmem:[%s3137_s17 + $0x10] sm:$0xff] %v2088_v18  ;;  %v2122_v37 = vld [vmem:[%s3003_s9 + $0x98] sm:$0xff] }
 0x303   : > { %2091 = vst [vmem:[%s3137_s17 + $0x18] sm:$0xff] %v2090_v10  ;;  %v2132_v12 = vld [vmem:[%s3003_s9 + $0xc0] sm:$0xff] }
 0x304   : > { %2097 = vst [vmem:[%s3137_s17 + $0x30] sm:$0xff] %v2096_v50  ;;  %v2134_v38 = vld [vmem:[%s3003_s9 + $0xc8] sm:$0xff] }
 0x305   : > { %2099 = vst [vmem:[%s3137_s17 + $0x38] sm:$0xff] %v2098_v11  ;;  %v2136_v59 = vld [vmem:[%s3003_s9 + $0xd0] sm:$0xff] }
 0x306   : > { %2101 = vst [vmem:[%s3137_s17 + $0x80] sm:$0xff] %v2100_v53  ;;  %v2138_v31 = vld [vmem:[%s3003_s9 + $0xd8] sm:$0xff] }
 0x307   : > { %2103 = vst [vmem:[%s3137_s17 + $0x88] sm:$0xff] %v2102_v62 }
 0x308   : > { %2105 = vst [vmem:[%s3137_s17 + $0x90] sm:$0xff] %v2104_v44 }
 0x309   : > { %2107 = vst [vmem:[%s3137_s17 + $0x98] sm:$0xff] %v2106_v7 }
 0x30a   : > { %2109 = vst [vmem:[%s3137_s17 + $0xa0] sm:$0xff] %v2108_v15 }
 0x30b   : > { %2111 = vst [vmem:[%s3137_s17 + $0xa8] sm:$0xff] %v2110_v16 }
 0x30c   : > { %2113 = vst [vmem:[%s3137_s17 + $0xb0] sm:$0xff] %v2112_v40 }
 0x30d   : > { %2115 = vst [vmem:[%s3137_s17 + $0xb8] sm:$0xff] %v2114_v35 }
 0x30e   : > { %2117 = vst [vmem:[%s3137_s17 + $0x100] sm:$0xff] %v2116_v47 }
 0x30f   : > { %2119 = vst [vmem:[%s3137_s17 + $0x108] sm:$0xff] %v2118_v2 }
 0x310   : > { %2121 = vst [vmem:[%s3137_s17 + $0x110] sm:$0xff] %v2120_v57 }
 0x311   : > { %2123 = vst [vmem:[%s3137_s17 + $0x118] sm:$0xff] %v2122_v37 }
 0x312   : > { %2125 = vst [vmem:[%s3137_s17 + $0x120] sm:$0xff] %v2124_v58 }
 0x313   : > { %2127 = vst [vmem:[%s3137_s17 + $0x128] sm:$0xff] %v2126_v48 }
 0x314   : > { %2129 = vst [vmem:[%s3137_s17 + $0x130] sm:$0xff] %v2128_v3 }
 0x315   : > { %2131 = vst [vmem:[%s3137_s17 + $0x138] sm:$0xff] %v2130_v60 }
 0x316   : > { %2133 = vst [vmem:[%s3137_s17 + $0x180] sm:$0xff] %v2132_v12 }
 0x317   : > { %2135 = vst [vmem:[%s3137_s17 + $0x188] sm:$0xff] %v2134_v38 }
 0x318   : > { %2137 = vst [vmem:[%s3137_s17 + $0x190] sm:$0xff] %v2136_v59 }
 0x319   : > { %2139 = vst [vmem:[%s3137_s17 + $0x198] sm:$0xff] %v2138_v31 }
 0x31a   : > { %2141 = vst [vmem:[%s3137_s17 + $0x1a0] sm:$0xff] %v2140_v13 }
 0x31b   : > { %2143 = vst [vmem:[%s3137_s17 + $0x1a8] sm:$0xff] %v2142_v54 }
 0x31c   : > { %2145 = vst [vmem:[%s3137_s17 + $0x1b0] sm:$0xff] %v2144_v22 }
 0x31d   : > { %2147 = vst [vmem:[%s3137_s17 + $0x1b8] sm:$0xff] %v2146_v63 }
 0x31e PF: > { %p9_p10 = scmp.ge.s32.totalorder %s2516_s13, 4   ;;  %s3215_s9 = smov %s2478_s10 }
 0x31f   : > { %s3216_s10 = smov %s2527_s16  ;;  %s3217_s11 = smov %s2516_s13 }
 0x320   :  { %11 = sbr.rel (!%p9_p10) target bundleno = 2 (0x2), region = 153 }

</bundles_post_ra>
